<compile_context>
chip_gen: v6e
topology: v6e:2x2x1
jax: 0.10.0
libtpu: 0.0.40
codegen_flags: <defaults>
</compile_context>

<pallas_src>
import functools

import numpy as np
import jax
import jax.numpy as jnp
from jax import lax
from jax.experimental import pallas as pl
from jax.experimental.pallas import tpu as pltpu


def _round_up(n, m):
    return ((n + m - 1) // m) * m


# ----------------------------------------------------------------------------
# Fused kernel: bottleneck attention + 4-layer MLP head + softmax, one body.
# ----------------------------------------------------------------------------
def _make_fused_kernel(width, W, window, TILE_B, row_off, out_pad):
    NL = TILE_B * window              # lanes per grid step; lane = b*window + h*W + w
    o1, o2, o3, o4 = row_off          # static row offsets of l1w/l2w/l3w/l4w in the pack

    def kernel(x_ref,                 # (1, NL)            f32  input pixels
               masks_ref,             # (9, NL)             f32  per-tap validity masks
               cp_ref,                # (width, 5)          f32  [w1, b1, b2, w3, b3]
               bias_ref,              # (4, bias_cols)      f32  MLP biases (BN folded)
               wpk_ref,               # (rows, wcols)       bf16 packed MXU weights
               out_ref,               # (TILE_B, out_pad)   f32  softmax output
               flat_ref):             # VMEM scratch (TILE_B, window) f32
        x = x_ref[...]                                              # (1, NL)
        w1 = cp_ref[:, 0:1]
        b1 = cp_ref[:, 1:2]
        b2 = cp_ref[:, 2:3]
        w3 = cp_ref[:, 3:4]
        b3 = cp_ref[0:1, 4:5]

        # -- conv1 (1x1, 1 -> width) + BN + ReLU : K=1 => pure VPU broadcast --
        out1 = jnp.maximum(x * w1 + b1, 0.0)                        # (width, NL) f32

        # -- conv2 (3x3, pad=1) + BN + ReLU : XLU rolls + host masks + ONE MXU matmul --
        # Valid taps never cross a batch window (|shift| <= W+1 < HW <= window); wrapped or
        # out-of-image positions are zeroed by the precomputed masks.
        taps = []
        t = 0
        for kh in range(3):
            for kw in range(3):
                s = (kh - 1) * W + (kw - 1)
                rolled = out1 if s == 0 else pltpu.roll(out1, shift=(-s) % NL, axis=1)
                taps.append(rolled * masks_ref[t:t + 1, :])         # f32 math (v5e-safe)
                t += 1
        taps.append(jnp.zeros_like(out1))                           # pad 9 -> 10 taps
        # Cast to bf16 in tile-aligned pairs (2*width rows) before the big concat.
        pieces = []
        for g in range(5):
            pair = jnp.concatenate(taps[2 * g:2 * g + 2], axis=0)   # (2*width, NL) f32
            pieces.append(pair.astype(jnp.bfloat16))
        patches = jnp.concatenate(pieces, axis=0)                   # (10*width, NL) bf16

        w2 = wpk_ref[0:width, 0:10 * width]                         # zero cols for pad tap
        out2 = jnp.dot(w2, patches, preferred_element_type=jnp.float32)
        out2 = jnp.maximum(out2 + b2, 0.0)                          # (width, NL) f32

        # -- conv3 (1x1, width -> 1) + BN + residual add + ReLU : sublane reduce (XLU) --
        flat_wide = jnp.sum(out2 * w3, axis=0, keepdims=True) + b3 + x
        flat_wide = jnp.maximum(flat_wide, 0.0)                     # (1, NL)

        # -- .view(B, -1): lanes -> (batch sublanes, window lanes) --
        # Each batch owns a 128-aligned window => unmasked full-lane stores.
        for b in range(TILE_B):
            flat_ref[b:b + 1, :] = flat_wide[:, b * window:(b + 1) * window]
        flat = flat_ref[...]                                        # (TILE_B, window) f32

        # -- MLP head: (Linear + folded BN + ReLU) x3, Linear, softmax --
        def dense(a, r0, r1, ncols, brow):
            w = wpk_ref[r0:r1, 0:ncols]                             # static, aligned slice
            y = jnp.dot(a.astype(jnp.bfloat16), w,
                        preferred_element_type=jnp.float32)
            return y + bias_ref[brow:brow + 1, 0:ncols]

        h1 = jnp.maximum(dense(flat, o1, o2, 256, 0), 0.0)
        h2 = jnp.maximum(dense(h1, o2, o3, 128, 1), 0.0)
        h3 = jnp.maximum(dense(h2, o3, o4, 64, 2), 0.0)
        logits = dense(h3, o4, o4 + 64, out_pad, 3)                 # (TILE_B, out_pad)

        m = jnp.max(logits, axis=-1, keepdims=True)
        e = jnp.exp(logits - m)                                     # EUP
        denom = jnp.sum(e, axis=-1, keepdims=True)
        # NOTE: approx reciprocal => rows sum to 1 only to ~1e-3.
        out_ref[...] = (e * pl.reciprocal(denom, approx=True)).astype(out_ref.dtype)

    return kernel


# ----------------------------------------------------------------------------
# Wrapper: layout plumbing only (pad / reshape / slice), one pallas_call.
# ----------------------------------------------------------------------------
def mlp_block_forward(x, kp, *, meta, output_dim):
    """Inference forward of MLP_block.  x: (B, C, H, W) float32."""
    B, C, H, W = x.shape
    assert meta["feature_dim"] == H * W, (
        f"INPUT_FEATURE_DIM should equal {H * W} (num_modal x feature_dim of each branch)")
    assert C == 1, "Bottleneck attention specialised to inplanes == 1"

    HW = H * W
    width = meta["width"]
    window = meta["window"]          # 128-multiple >= HW; one batch element per window
    out_pad = meta["out_pad"]

    # Batch tiling: up to 128 rows per grid step (raises MXU occupancy for big batches).
    TILE_B = min(128, _round_up(max(B, 8), 8))
    B_pad = _round_up(B, TILE_B)
    num_tiles = B_pad // TILE_B
    NL = TILE_B * window

    # (B, C, H, W) -> (1, B_pad*window): pixel (b,h,w) at lane b*window + h*W + w.
    xp = jnp.zeros((B_pad, window), jnp.float32).at[:B, :HW].set(
        x.reshape(B, HW).astype(jnp.float32))
    x_wide = xp.reshape(1, B_pad * window)

    # Host-precomputed per-tap validity masks (static fn of H, W, window, TILE_B).
    p = np.arange(NL) % window
    row, col = p // W, p % W
    in_img = p < HW
    masks = np.zeros((9, NL), np.float32)
    t = 0
    for kh in range(3):
        for kw in range(3):
            dh, dw = kh - 1, kw - 1
            masks[t] = (in_img & (row + dh >= 0) & (row + dh < H)
                        & (col + dw >= 0) & (col + dw < W))
            t += 1
    masks = jnp.asarray(masks)

    total_rows, wcols = kp["wpk"].shape
    bias_cols = kp["bias"].shape[1]

    flops = 2 * num_tiles * (10 * width * width * NL
                             + TILE_B * (window * 256 + 256 * 128 + 128 * 64 + 64 * out_pad))
    bytes_accessed = ((x_wide.size + masks.size + kp["cp"].size + kp["bias"].size) * 4
                      + kp["wpk"].size * 2 + B_pad * out_pad * 4)

    out = pl.pallas_call(
        _make_fused_kernel(width, W, window, TILE_B, meta["row_off"], out_pad),
        grid=(num_tiles,),
        in_specs=[
            pl.BlockSpec((1, NL), lambda i: (0, i)),                # input pixels (tiled)
            pl.BlockSpec((9, NL), lambda i: (0, 0)),                # masks (resident)
            pl.BlockSpec((width, 5), lambda i: (0, 0)),             # conv params (resident)
            pl.BlockSpec((4, bias_cols), lambda i: (0, 0)),         # MLP biases (resident)
            pl.BlockSpec((total_rows, wcols), lambda i: (0, 0)),    # weight pack (resident)
        ],
        out_specs=pl.BlockSpec((TILE_B, out_pad), lambda i: (i, 0)),
        out_shape=jax.ShapeDtypeStruct((B_pad, out_pad), jnp.float32),
        scratch_shapes=[pltpu.VMEM((TILE_B, window), jnp.float32)],
        compiler_params=pltpu.CompilerParams(
            dimension_semantics=("parallel",)),                     # megacore on v7x
        cost_estimate=pl.CostEstimate(flops=int(flops),
                                      transcendentals=int(B_pad * out_pad),
                                      bytes_accessed=int(bytes_accessed)),
    )(x_wide, masks, kp["cp"], kp["bias"], kp["wpk"])

    return out[:B, :output_dim]


# ----------------------------------------------------------------------------
# Parameter preparation: fold BN (inference) into weights, pack kernel-ready arrays.
# All offsets are 16-row aligned so every in-kernel bf16 slice is tile-aligned.
# ----------------------------------------------------------------------------
def _bn_fold_np(stats, eps=1e-5):
    gamma, beta, mean, var = (np.asarray(a, np.float32) for a in stats)
    scale = gamma / np.sqrt(var + eps)
    shift = beta - mean * scale
    return scale, shift


def prepare_kernel_params(raw):
    att = raw["att"]
    conv1_w = np.asarray(att["conv1_w"], np.float32)   # (width, 1, 1, 1)
    conv2_w = np.asarray(att["conv2_w"], np.float32)   # (width, width, 3, 3)
    conv3_w = np.asarray(att["conv3_w"], np.float32)   # (1, width, 1, 1)
    width = conv1_w.shape[0]
    assert width % 8 == 0, "kernel assumes conv width is a sublane multiple"

    sc1, sh1 = _bn_fold_np(att["bn1"])
    sc2, sh2 = _bn_fold_np(att["bn2"])
    sc3, sh3 = _bn_fold_np(att["bn3"])

    w1 = conv1_w[:, 0, 0, 0] * sc1                                           # (width,)
    # (out,in,kh,kw) -> column index (kh*3+kw)*width + in: matches the kernel tap order.
    w2 = conv2_w.transpose(2, 3, 1, 0).reshape(9 * width, width).T * sc2[:, None]
    w3 = conv3_w[0, :, 0, 0] * sc3[0]                                        # (width,)

    cp = np.zeros((width, 5), np.float32)
    cp[:, 0] = w1
    cp[:, 1] = sh1
    cp[:, 2] = sh2
    cp[:, 3] = w3
    cp[0, 4] = sh3[0]

    def fold_linear(wb, bn_stats):
        w = np.asarray(wb[0], np.float32)
        b = np.asarray(wb[1], np.float32)
        if bn_stats is None:
            return w, b
        s, t = _bn_fold_np(bn_stats)
        return w * s[None, :], b * s + t

    l1w, l1b = fold_linear(raw["l1"], raw["bn1"])
    l2w, l2b = fold_linear(raw["l2"], raw["bn2"])
    l3w, l3b = fold_linear(raw["l3"], raw["bn3"])
    l4w, l4b = fold_linear(raw["l4"], None)

    feature_dim = l1w.shape[0]
    output_dim = l4w.shape[1]
    window = _round_up(max(feature_dim, 128), 128)
    out_pad = _round_up(max(output_dim, 128), 128)
    wcols = max(256, out_pad, _round_up(10 * width, 128))
    bias_cols = max(256, out_pad)

    o1 = _round_up(width, 16)
    o2 = o1 + window
    o3 = o2 + 256
    o4 = o3 + 128
    total_rows = o4 + 64

    wpk = np.zeros((total_rows, wcols), np.float32)
    wpk[0:width, 0:9 * width] = w2                      # cols 9w..10w-1 stay zero (pad tap)
    wpk[o1:o1 + feature_dim, 0:256] = l1w               # zero rows absorb padding lanes
    wpk[o2:o2 + 256, 0:128] = l2w
    wpk[o3:o3 + 128, 0:64] = l3w
    wpk[o4:o4 + 64, 0:output_dim] = l4w

    bias = np.zeros((4, bias_cols), np.float32)
    bias[0, :256] = l1b
    bias[1, :128] = l2b
    bias[2, :64] = l3b
    bias[3, :out_pad] = -1e30                           # padded logits ignored by softmax
    bias[3, :output_dim] = l4b

    kparams = {
        "cp": jnp.asarray(cp),
        "bias": jnp.asarray(bias),
        "wpk": jnp.asarray(wpk, dtype=jnp.bfloat16),
    }
    meta = {
        "width": width, "window": window, "out_pad": out_pad,
        "row_off": (o1, o2, o3, o4),
        "feature_dim": feature_dim, "output_dim": output_dim,
    }
    return kparams, meta


def init_raw_params(key, feature_dim, output_dim, inplanes, planes, base_width):
    width = int(planes * base_width / 64)
    ks = jax.random.split(key, 13)

    def linear(k, fan_in, fan_out):
        bound = 1.0 / (fan_in ** 0.5)
        kw, kb = jax.random.split(k)
        return (jax.random.uniform(kw, (fan_in, fan_out), jnp.float32, -bound, bound),
                jax.random.uniform(kb, (fan_out,), jnp.float32, -bound, bound))

    def bn(k, n):
        gamma = 1.0 + 0.05 * jax.random.normal(k, (n,), jnp.float32)
        beta = 0.05 * jnp.ones((n,), jnp.float32)
        mean = jnp.zeros((n,), jnp.float32)
        var = jnp.ones((n,), jnp.float32)
        return (gamma, beta, mean, var)

    att = {
        "conv1_w": 0.2 * jax.random.normal(ks[0], (width, inplanes, 1, 1), jnp.float32),
        "bn1": bn(ks[1], width),
        "conv2_w": 0.2 * jax.random.normal(ks[2], (width, width, 3, 3), jnp.float32),
        "bn2": bn(ks[3], width),
        "conv3_w": 0.2 * jax.random.normal(ks[4], (inplanes, width, 1, 1), jnp.float32),
        "bn3": bn(ks[5], inplanes),
    }
    return {
        "att": att,
        "l1": linear(ks[6], feature_dim, 256), "bn1": bn(ks[7], 256),
        "l2": linear(ks[8], 256, 128), "bn2": bn(ks[9], 128),
        "l3": linear(ks[10], 128, 64), "bn3": bn(ks[11], 64),
        "l4": linear(ks[12], 64, output_dim),
    }


# ----------------------------------------------------------------------------
# Pure-JAX (XLA) reference with identical inference semantics, f32 throughout.
# ----------------------------------------------------------------------------
def reference_forward(x, raw):
    eps = 1e-5
    att = raw["att"]

    def bn2d(y, stats):
        g, b, m, v = stats
        inv = g / jnp.sqrt(v + eps)
        return (y - m[None, :, None, None]) * inv[None, :, None, None] + b[None, :, None, None]

    def conv(y, w, pad):
        return lax.conv_general_dilated(
            y, w, (1, 1), [(pad, pad), (pad, pad)],
            dimension_numbers=("NCHW", "OIHW", "NCHW"))

    identity = x
    y = jax.nn.relu(bn2d(conv(x, att["conv1_w"], 0), att["bn1"]))
    y = jax.nn.relu(bn2d(conv(y, att["conv2_w"], 1), att["bn2"]))
    y = bn2d(conv(y, att["conv3_w"], 0), att["bn3"])
    y = jax.nn.relu(y + identity)                          # fuse_type = 'add'

    f = y.reshape(x.shape[0], -1)

    def lin_bn_relu(f, wb, stats):
        w, b = wb
        g, be, m, v = stats
        z = f @ w + b
        return jax.nn.relu((z - m) / jnp.sqrt(v + eps) * g + be)

    f = lin_bn_relu(f, raw["l1"], raw["bn1"])
    f = lin_bn_relu(f, raw["l2"], raw["bn2"])
    f = lin_bn_relu(f, raw["l3"], raw["bn3"])
    w, b = raw["l4"]
    return jax.nn.softmax(f @ w + b, axis=-1)


# ----------------------------------------------------------------------------
if __name__ == "__main__":
    key = jax.random.PRNGKey(0)
    kx, kp_key = jax.random.split(key)

    # Small shapes consistent with the module: B=2, C=INPUT_DIM=1, H=4 (num_modal),
    # W=16 (per-branch feature dim) -> feature_dim = H*W = 64, output_dim = 4.
    B, C, H, W = 2, 1, 4, 16
    feature_dim = H * W
    output_dim = 4
    attention_config = {"INPUT_DIM": C, "HIDDEN_DIM": 8, "BASE_WIDTH": 64,
                        "FUSE_TYPE": "add"}

    x = jax.random.normal(kx, (B, C, H, W), jnp.float32)
    raw = init_raw_params(kp_key, feature_dim, output_dim,
                          attention_config["INPUT_DIM"],
                          attention_config["HIDDEN_DIM"],
                          attention_config["BASE_WIDTH"])
    kparams, meta = prepare_kernel_params(raw)   # BN folded + packed once, off the hot path

    fwd = jax.jit(functools.partial(mlp_block_forward, meta=meta, output_dim=output_dim))
    out = jax.block_until_ready(fwd(x, kparams))

    assert out.shape == (B, output_dim), out.shape
    assert bool(jnp.all(jnp.isfinite(out)))
    assert bool(jnp.allclose(jnp.sum(out, axis=-1), 1.0, atol=5e-3))

    ref = reference_forward(x, raw)
    assert bool(jnp.allclose(out, ref, atol=3e-2)), float(jnp.max(jnp.abs(out - ref)))

    print("KERNEL_OK")
</pallas_src>

<mosaic_0001>
module attributes {stable_mosaic.version = 11 : i64} {
  func.func @kernel(%arg0: i32, %arg1: memref<1x1024xf32, #tpu.memory_space<vmem>>, %arg2: memref<9x1024xf32, #tpu.memory_space<vmem>>, %arg3: memref<8x5xf32, #tpu.memory_space<vmem>>, %arg4: memref<4x256xf32, #tpu.memory_space<vmem>>, %arg5: memref<592x256xbf16, #tpu.memory_space<vmem>>, %arg6: memref<8x128xf32, #tpu.memory_space<vmem>>, %arg7: memref<8x128xf32, #tpu.memory_space<vmem>>) attributes {dimension_semantics = [#tpu.dimension_semantics<parallel>], iteration_bounds = array<i64: 1>, scalar_prefetch = 0 : i64, scratch_operands = 1 : i64, tpu.core_type = #tpu.core_type<tc>, window_params = [{transform_indices = @transform_0, window_bounds = array<i64: 1, 1024>}, {pipeline_mode = #tpu.pipeline_mode<synchronous>, transform_indices = @transform_1, window_bounds = array<i64: 9, 1024>}, {pipeline_mode = #tpu.pipeline_mode<synchronous>, transform_indices = @transform_2, window_bounds = array<i64: 8, 5>}, {pipeline_mode = #tpu.pipeline_mode<synchronous>, transform_indices = @transform_3, window_bounds = array<i64: 4, 256>}, {pipeline_mode = #tpu.pipeline_mode<synchronous>, transform_indices = @transform_4, window_bounds = array<i64: 592, 256>}, {transform_indices = @transform_5, window_bounds = array<i64: 8, 128>}]} {
    %c0 = arith.constant 0 : index
    %c0_0 = arith.constant 0 : index
    %0 = vector.load %arg1[%c0, %c0_0] : memref<1x1024xf32, #tpu.memory_space<vmem>>, vector<1x1024xf32>
    %c0_1 = arith.constant 0 : index
    %c0_2 = arith.constant 0 : index
    %1 = vector.load %arg3[%c0_1, %c0_2] : memref<8x5xf32, #tpu.memory_space<vmem>>, vector<8x1xf32>
    %c0_3 = arith.constant 0 : index
    %c1 = arith.constant 1 : index
    %2 = vector.load %arg3[%c0_3, %c1] : memref<8x5xf32, #tpu.memory_space<vmem>>, vector<8x1xf32>
    %c0_4 = arith.constant 0 : index
    %c2 = arith.constant 2 : index
    %3 = vector.load %arg3[%c0_4, %c2] : memref<8x5xf32, #tpu.memory_space<vmem>>, vector<8x1xf32>
    %c0_5 = arith.constant 0 : index
    %c3 = arith.constant 3 : index
    %4 = vector.load %arg3[%c0_5, %c3] : memref<8x5xf32, #tpu.memory_space<vmem>>, vector<8x1xf32>
    %c0_6 = arith.constant 0 : index
    %c4 = arith.constant 4 : index
    %5 = vector.load %arg3[%c0_6, %c4] : memref<8x5xf32, #tpu.memory_space<vmem>>, vector<1x1xf32>
    %6 = vector.broadcast %0 : vector<1x1024xf32> to vector<8x1024xf32>
    %7 = vector.broadcast %1 : vector<8x1xf32> to vector<8x1024xf32>
    %8 = arith.mulf %6, %7 : vector<8x1024xf32>
    %9 = vector.broadcast %2 : vector<8x1xf32> to vector<8x1024xf32>
    %10 = arith.addf %8, %9 : vector<8x1024xf32>
    %cst = arith.constant 0.000000e+00 : f32
    %11 = vector.broadcast %cst : f32 to vector<8x1024xf32>
    %12 = arith.maximumf %10, %11 : vector<8x1024xf32>
    %c17_i32 = arith.constant 17 : i32
    %13 = tpu.dynamic_rotate %12 by %c17_i32 dim 1 : vector<8x1024xf32>, i32 -> vector<8x1024xf32>
    %c0_7 = arith.constant 0 : index
    %c0_8 = arith.constant 0 : index
    %14 = vector.load %arg2[%c0_7, %c0_8] : memref<9x1024xf32, #tpu.memory_space<vmem>>, vector<1x1024xf32>
    %15 = vector.broadcast %14 : vector<1x1024xf32> to vector<8x1024xf32>
    %16 = arith.mulf %13, %15 : vector<8x1024xf32>
    %c16_i32 = arith.constant 16 : i32
    %17 = tpu.dynamic_rotate %12 by %c16_i32 dim 1 : vector<8x1024xf32>, i32 -> vector<8x1024xf32>
    %c1_9 = arith.constant 1 : index
    %c0_10 = arith.constant 0 : index
    %18 = vector.load %arg2[%c1_9, %c0_10] : memref<9x1024xf32, #tpu.memory_space<vmem>>, vector<1x1024xf32>
    %19 = vector.broadcast %18 : vector<1x1024xf32> to vector<8x1024xf32>
    %20 = arith.mulf %17, %19 : vector<8x1024xf32>
    %c15_i32 = arith.constant 15 : i32
    %21 = tpu.dynamic_rotate %12 by %c15_i32 dim 1 : vector<8x1024xf32>, i32 -> vector<8x1024xf32>
    %c2_11 = arith.constant 2 : index
    %c0_12 = arith.constant 0 : index
    %22 = vector.load %arg2[%c2_11, %c0_12] : memref<9x1024xf32, #tpu.memory_space<vmem>>, vector<1x1024xf32>
    %23 = vector.broadcast %22 : vector<1x1024xf32> to vector<8x1024xf32>
    %24 = arith.mulf %21, %23 : vector<8x1024xf32>
    %c1_i32 = arith.constant 1 : i32
    %25 = tpu.dynamic_rotate %12 by %c1_i32 dim 1 : vector<8x1024xf32>, i32 -> vector<8x1024xf32>
    %c3_13 = arith.constant 3 : index
    %c0_14 = arith.constant 0 : index
    %26 = vector.load %arg2[%c3_13, %c0_14] : memref<9x1024xf32, #tpu.memory_space<vmem>>, vector<1x1024xf32>
    %27 = vector.broadcast %26 : vector<1x1024xf32> to vector<8x1024xf32>
    %28 = arith.mulf %25, %27 : vector<8x1024xf32>
    %c4_15 = arith.constant 4 : index
    %c0_16 = arith.constant 0 : index
    %29 = vector.load %arg2[%c4_15, %c0_16] : memref<9x1024xf32, #tpu.memory_space<vmem>>, vector<1x1024xf32>
    %30 = vector.broadcast %29 : vector<1x1024xf32> to vector<8x1024xf32>
    %31 = arith.mulf %12, %30 : vector<8x1024xf32>
    %c1023_i32 = arith.constant 1023 : i32
    %32 = tpu.dynamic_rotate %12 by %c1023_i32 dim 1 : vector<8x1024xf32>, i32 -> vector<8x1024xf32>
    %c5 = arith.constant 5 : index
    %c0_17 = arith.constant 0 : index
    %33 = vector.load %arg2[%c5, %c0_17] : memref<9x1024xf32, #tpu.memory_space<vmem>>, vector<1x1024xf32>
    %34 = vector.broadcast %33 : vector<1x1024xf32> to vector<8x1024xf32>
    %35 = arith.mulf %32, %34 : vector<8x1024xf32>
    %c1009_i32 = arith.constant 1009 : i32
    %36 = tpu.dynamic_rotate %12 by %c1009_i32 dim 1 : vector<8x1024xf32>, i32 -> vector<8x1024xf32>
    %c6 = arith.constant 6 : index
    %c0_18 = arith.constant 0 : index
    %37 = vector.load %arg2[%c6, %c0_18] : memref<9x1024xf32, #tpu.memory_space<vmem>>, vector<1x1024xf32>
    %38 = vector.broadcast %37 : vector<1x1024xf32> to vector<8x1024xf32>
    %39 = arith.mulf %36, %38 : vector<8x1024xf32>
    %c1008_i32 = arith.constant 1008 : i32
    %40 = tpu.dynamic_rotate %12 by %c1008_i32 dim 1 : vector<8x1024xf32>, i32 -> vector<8x1024xf32>
    %c7 = arith.constant 7 : index
    %c0_19 = arith.constant 0 : index
    %41 = vector.load %arg2[%c7, %c0_19] : memref<9x1024xf32, #tpu.memory_space<vmem>>, vector<1x1024xf32>
    %42 = vector.broadcast %41 : vector<1x1024xf32> to vector<8x1024xf32>
    %43 = arith.mulf %40, %42 : vector<8x1024xf32>
    %c1007_i32 = arith.constant 1007 : i32
    %44 = tpu.dynamic_rotate %12 by %c1007_i32 dim 1 : vector<8x1024xf32>, i32 -> vector<8x1024xf32>
    %c8 = arith.constant 8 : index
    %c0_20 = arith.constant 0 : index
    %45 = vector.load %arg2[%c8, %c0_20] : memref<9x1024xf32, #tpu.memory_space<vmem>>, vector<1x1024xf32>
    %46 = vector.broadcast %45 : vector<1x1024xf32> to vector<8x1024xf32>
    %47 = arith.mulf %44, %46 : vector<8x1024xf32>
    %cst_21 = arith.constant 0.000000e+00 : f32
    %48 = vector.broadcast %cst_21 : f32 to vector<8x1024xf32>
    %49 = tpu.concatenate %16, %20 in 0 : vector<8x1024xf32>, vector<8x1024xf32> -> vector<16x1024xf32>
    %50 = arith.truncf %49 : vector<16x1024xf32> to vector<16x1024xbf16>
    %51 = tpu.concatenate %24, %28 in 0 : vector<8x1024xf32>, vector<8x1024xf32> -> vector<16x1024xf32>
    %52 = arith.truncf %51 : vector<16x1024xf32> to vector<16x1024xbf16>
    %53 = tpu.concatenate %31, %35 in 0 : vector<8x1024xf32>, vector<8x1024xf32> -> vector<16x1024xf32>
    %54 = arith.truncf %53 : vector<16x1024xf32> to vector<16x1024xbf16>
    %55 = tpu.concatenate %39, %43 in 0 : vector<8x1024xf32>, vector<8x1024xf32> -> vector<16x1024xf32>
    %56 = arith.truncf %55 : vector<16x1024xf32> to vector<16x1024xbf16>
    %57 = tpu.concatenate %47, %48 in 0 : vector<8x1024xf32>, vector<8x1024xf32> -> vector<16x1024xf32>
    %58 = arith.truncf %57 : vector<16x1024xf32> to vector<16x1024xbf16>
    %59 = tpu.concatenate %50, %52, %54, %56, %58 in 0 : vector<16x1024xbf16>, vector<16x1024xbf16>, vector<16x1024xbf16>, vector<16x1024xbf16>, vector<16x1024xbf16> -> vector<80x1024xbf16>
    %c0_22 = arith.constant 0 : index
    %c0_23 = arith.constant 0 : index
    %60 = vector.load %arg5[%c0_22, %c0_23] : memref<592x256xbf16, #tpu.memory_space<vmem>>, vector<8x80xbf16>
    %cst_24 = arith.constant dense<0.000000e+00> : vector<8x1024xf32>
    %61 = tpu.matmul %60, %59, %cst_24 {dimension_numbers = #tpu.dot_dimension_numbers<[1], [0], [0], [1], [0, 0, 1, 1], [], []>} : vector<8x80xbf16>, vector<80x1024xbf16>, vector<8x1024xf32> -> vector<8x1024xf32>
    %62 = vector.broadcast %3 : vector<8x1xf32> to vector<8x1024xf32>
    %63 = arith.addf %61, %62 : vector<8x1024xf32>
    %cst_25 = arith.constant 0.000000e+00 : f32
    %64 = vector.broadcast %cst_25 : f32 to vector<8x1024xf32>
    %65 = arith.maximumf %63, %64 : vector<8x1024xf32>
    %66 = vector.broadcast %4 : vector<8x1xf32> to vector<8x1024xf32>
    %67 = arith.mulf %65, %66 : vector<8x1024xf32>
    %cst_26 = arith.constant dense<0.000000e+00> : vector<1024xf32>
    %68 = vector.multi_reduction <add>, %67, %cst_26 [0] : vector<8x1024xf32> to vector<1024xf32>
    %69 = vector.shape_cast %68 : vector<1024xf32> to vector<1x1024xf32>
    %70 = vector.broadcast %5 : vector<1x1xf32> to vector<1x1024xf32>
    %71 = arith.addf %69, %70 : vector<1x1024xf32>
    %72 = arith.addf %71, %0 : vector<1x1024xf32>
    %cst_27 = arith.constant 0.000000e+00 : f32
    %73 = vector.broadcast %cst_27 : f32 to vector<1x1024xf32>
    %74 = arith.maximumf %72, %73 : vector<1x1024xf32>
    %75 = vector.extract_strided_slice %74 {offsets = [0, 0], sizes = [1, 128], strides = [1, 1]} : vector<1x1024xf32> to vector<1x128xf32>
    %c0_28 = arith.constant 0 : index
    %c0_29 = arith.constant 0 : index
    %76 = vector.load %arg7[%c0_28, %c0_29] : memref<8x128xf32, #tpu.memory_space<vmem>>, vector<1x128xf32>
    tpu.vector_store %arg7[%c0_28, %c0_29], %75 {strides = array<i32>} : memref<8x128xf32, #tpu.memory_space<vmem>>, vector<1x128xf32>,
    %77 = vector.extract_strided_slice %74 {offsets = [0, 128], sizes = [1, 128], strides = [1, 1]} : vector<1x1024xf32> to vector<1x128xf32>
    %c1_30 = arith.constant 1 : index
    %c0_31 = arith.constant 0 : index
    %78 = vector.load %arg7[%c1_30, %c0_31] : memref<8x128xf32, #tpu.memory_space<vmem>>, vector<1x128xf32>
    tpu.vector_store %arg7[%c1_30, %c0_31], %77 {strides = array<i32>} : memref<8x128xf32, #tpu.memory_space<vmem>>, vector<1x128xf32>,
    %79 = vector.extract_strided_slice %74 {offsets = [0, 256], sizes = [1, 128], strides = [1, 1]} : vector<1x1024xf32> to vector<1x128xf32>
    %c2_32 = arith.constant 2 : index
    %c0_33 = arith.constant 0 : index
    %80 = vector.load %arg7[%c2_32, %c0_33] : memref<8x128xf32, #tpu.memory_space<vmem>>, vector<1x128xf32>
    tpu.vector_store %arg7[%c2_32, %c0_33], %79 {strides = array<i32>} : memref<8x128xf32, #tpu.memory_space<vmem>>, vector<1x128xf32>,
    %81 = vector.extract_strided_slice %74 {offsets = [0, 384], sizes = [1, 128], strides = [1, 1]} : vector<1x1024xf32> to vector<1x128xf32>
    %c3_34 = arith.constant 3 : index
    %c0_35 = arith.constant 0 : index
    %82 = vector.load %arg7[%c3_34, %c0_35] : memref<8x128xf32, #tpu.memory_space<vmem>>, vector<1x128xf32>
    tpu.vector_store %arg7[%c3_34, %c0_35], %81 {strides = array<i32>} : memref<8x128xf32, #tpu.memory_space<vmem>>, vector<1x128xf32>,
    %83 = vector.extract_strided_slice %74 {offsets = [0, 512], sizes = [1, 128], strides = [1, 1]} : vector<1x1024xf32> to vector<1x128xf32>
    %c4_36 = arith.constant 4 : index
    %c0_37 = arith.constant 0 : index
    %84 = vector.load %arg7[%c4_36, %c0_37] : memref<8x128xf32, #tpu.memory_space<vmem>>, vector<1x128xf32>
    tpu.vector_store %arg7[%c4_36, %c0_37], %83 {strides = array<i32>} : memref<8x128xf32, #tpu.memory_space<vmem>>, vector<1x128xf32>,
    %85 = vector.extract_strided_slice %74 {offsets = [0, 640], sizes = [1, 128], strides = [1, 1]} : vector<1x1024xf32> to vector<1x128xf32>
    %c5_38 = arith.constant 5 : index
    %c0_39 = arith.constant 0 : index
    %86 = vector.load %arg7[%c5_38, %c0_39] : memref<8x128xf32, #tpu.memory_space<vmem>>, vector<1x128xf32>
    tpu.vector_store %arg7[%c5_38, %c0_39], %85 {strides = array<i32>} : memref<8x128xf32, #tpu.memory_space<vmem>>, vector<1x128xf32>,
    %87 = vector.extract_strided_slice %74 {offsets = [0, 768], sizes = [1, 128], strides = [1, 1]} : vector<1x1024xf32> to vector<1x128xf32>
    %c6_40 = arith.constant 6 : index
    %c0_41 = arith.constant 0 : index
    %88 = vector.load %arg7[%c6_40, %c0_41] : memref<8x128xf32, #tpu.memory_space<vmem>>, vector<1x128xf32>
    tpu.vector_store %arg7[%c6_40, %c0_41], %87 {strides = array<i32>} : memref<8x128xf32, #tpu.memory_space<vmem>>, vector<1x128xf32>,
    %89 = vector.extract_strided_slice %74 {offsets = [0, 896], sizes = [1, 128], strides = [1, 1]} : vector<1x1024xf32> to vector<1x128xf32>
    %c7_42 = arith.constant 7 : index
    %c0_43 = arith.constant 0 : index
    %90 = vector.load %arg7[%c7_42, %c0_43] : memref<8x128xf32, #tpu.memory_space<vmem>>, vector<1x128xf32>
    tpu.vector_store %arg7[%c7_42, %c0_43], %89 {strides = array<i32>} : memref<8x128xf32, #tpu.memory_space<vmem>>, vector<1x128xf32>,
    %c0_44 = arith.constant 0 : index
    %c0_45 = arith.constant 0 : index
    %91 = vector.load %arg7[%c0_44, %c0_45] : memref<8x128xf32, #tpu.memory_space<vmem>>, vector<8x128xf32>
    %c16 = arith.constant 16 : index
    %c0_46 = arith.constant 0 : index
    %92 = vector.load %arg5[%c16, %c0_46] : memref<592x256xbf16, #tpu.memory_space<vmem>>, vector<128x256xbf16>
    %93 = arith.truncf %91 : vector<8x128xf32> to vector<8x128xbf16>
    %cst_47 = arith.constant dense<0.000000e+00> : vector<8x256xf32>
    %94 = tpu.matmul %93, %92, %cst_47 {dimension_numbers = #tpu.dot_dimension_numbers<[1], [0], [0], [1], [0, 0, 1, 1], [], []>} : vector<8x128xbf16>, vector<128x256xbf16>, vector<8x256xf32> -> vector<8x256xf32>
    %c0_48 = arith.constant 0 : index
    %c0_49 = arith.constant 0 : index
    %95 = vector.load %arg4[%c0_48, %c0_49] : memref<4x256xf32, #tpu.memory_space<vmem>>, vector<1x256xf32>
    %96 = vector.broadcast %95 : vector<1x256xf32> to vector<8x256xf32>
    %97 = arith.addf %94, %96 : vector<8x256xf32>
    %cst_50 = arith.constant 0.000000e+00 : f32
    %98 = vector.broadcast %cst_50 : f32 to vector<8x256xf32>
    %99 = arith.maximumf %97, %98 : vector<8x256xf32>
    %c144 = arith.constant 144 : index
    %c0_51 = arith.constant 0 : index
    %100 = vector.load %arg5[%c144, %c0_51] : memref<592x256xbf16, #tpu.memory_space<vmem>>, vector<256x128xbf16>
    %101 = arith.truncf %99 : vector<8x256xf32> to vector<8x256xbf16>
    %cst_52 = arith.constant dense<0.000000e+00> : vector<8x128xf32>
    %102 = tpu.matmul %101, %100, %cst_52 {dimension_numbers = #tpu.dot_dimension_numbers<[1], [0], [0], [1], [0, 0, 1, 1], [], []>} : vector<8x256xbf16>, vector<256x128xbf16>, vector<8x128xf32> -> vector<8x128xf32>
    %c1_53 = arith.constant 1 : index
    %c0_54 = arith.constant 0 : index
    %103 = vector.load %arg4[%c1_53, %c0_54] : memref<4x256xf32, #tpu.memory_space<vmem>>, vector<1x128xf32>
    %104 = vector.broadcast %103 : vector<1x128xf32> to vector<8x128xf32>
    %105 = arith.addf %102, %104 : vector<8x128xf32>
    %cst_55 = arith.constant 0.000000e+00 : f32
    %106 = vector.broadcast %cst_55 : f32 to vector<8x128xf32>
    %107 = arith.maximumf %105, %106 : vector<8x128xf32>
    %c400 = arith.constant 400 : index
    %c0_56 = arith.constant 0 : index
    %108 = vector.load %arg5[%c400, %c0_56] : memref<592x256xbf16, #tpu.memory_space<vmem>>, vector<128x64xbf16>
    %109 = arith.truncf %107 : vector<8x128xf32> to vector<8x128xbf16>
    %cst_57 = arith.constant dense<0.000000e+00> : vector<8x64xf32>
    %110 = tpu.matmul %109, %108, %cst_57 {dimension_numbers = #tpu.dot_dimension_numbers<[1], [0], [0], [1], [0, 0, 1, 1], [], []>} : vector<8x128xbf16>, vector<128x64xbf16>, vector<8x64xf32> -> vector<8x64xf32>
    %c2_58 = arith.constant 2 : index
    %c0_59 = arith.constant 0 : index
    %111 = vector.load %arg4[%c2_58, %c0_59] : memref<4x256xf32, #tpu.memory_space<vmem>>, vector<1x64xf32>
    %112 = vector.broadcast %111 : vector<1x64xf32> to vector<8x64xf32>
    %113 = arith.addf %110, %112 : vector<8x64xf32>
    %cst_60 = arith.constant 0.000000e+00 : f32
    %114 = vector.broadcast %cst_60 : f32 to vector<8x64xf32>
    %115 = arith.maximumf %113, %114 : vector<8x64xf32>
    %c528 = arith.constant 528 : index
    %c0_61 = arith.constant 0 : index
    %116 = vector.load %arg5[%c528, %c0_61] : memref<592x256xbf16, #tpu.memory_space<vmem>>, vector<64x128xbf16>
    %117 = arith.truncf %115 : vector<8x64xf32> to vector<8x64xbf16>
    %cst_62 = arith.constant dense<0.000000e+00> : vector<8x128xf32>
    %118 = tpu.matmul %117, %116, %cst_62 {dimension_numbers = #tpu.dot_dimension_numbers<[1], [0], [0], [1], [0, 0, 1, 1], [], []>} : vector<8x64xbf16>, vector<64x128xbf16>, vector<8x128xf32> -> vector<8x128xf32>
    %c3_63 = arith.constant 3 : index
    %c0_64 = arith.constant 0 : index
    %119 = vector.load %arg4[%c3_63, %c0_64] : memref<4x256xf32, #tpu.memory_space<vmem>>, vector<1x128xf32>
    %120 = vector.broadcast %119 : vector<1x128xf32> to vector<8x128xf32>
    %121 = arith.addf %118, %120 : vector<8x128xf32>
    %cst_65 = arith.constant dense<0xFF800000> : vector<8xf32>
    %122 = vector.multi_reduction <maximumf>, %121, %cst_65 [1] : vector<8x128xf32> to vector<8xf32>
    %123 = vector.shape_cast %122 : vector<8xf32> to vector<8x1xf32>
    %124 = vector.broadcast %123 : vector<8x1xf32> to vector<8x128xf32>
    %125 = arith.subf %121, %124 : vector<8x128xf32>
    %126 = math.exp %125 : vector<8x128xf32>
    %cst_66 = arith.constant dense<0.000000e+00> : vector<8xf32>
    %127 = vector.multi_reduction <add>, %126, %cst_66 [1] : vector<8x128xf32> to vector<8xf32>
    %128 = vector.shape_cast %127 : vector<8xf32> to vector<8x1xf32>
    %129 = tpu.reciprocal %128 {approx = true} : vector<8x1xf32> -> vector<8x1xf32>
    %130 = vector.broadcast %129 : vector<8x1xf32> to vector<8x128xf32>
    %131 = arith.mulf %126, %130 : vector<8x128xf32>
    %c0_67 = arith.constant 0 : index
    %c0_68 = arith.constant 0 : index
    %132 = vector.load %arg6[%c0_67, %c0_68] : memref<8x128xf32, #tpu.memory_space<vmem>>, vector<8x128xf32>
    tpu.vector_store %arg6[%c0_67, %c0_68], %131 {strides = array<i32>} : memref<8x128xf32, #tpu.memory_space<vmem>>, vector<8x128xf32>,
    return
  }
  func.func @transform_0(%arg0: i32) -> (i32, i32) {
    %c0_i32 = arith.constant 0 : i32
    %c0_i32_0 = arith.constant 0 : i32
    return %c0_i32, %arg0 : i32, i32
  }
  func.func @transform_1(%arg0: i32) -> (i32, i32) {
    %c0_i32 = arith.constant 0 : i32
    %c0_i32_0 = arith.constant 0 : i32
    %c0_i32_1 = arith.constant 0 : i32
    return %c0_i32, %c0_i32_0 : i32, i32
  }
  func.func @transform_2(%arg0: i32) -> (i32, i32) {
    %c0_i32 = arith.constant 0 : i32
    %c0_i32_0 = arith.constant 0 : i32
    %c0_i32_1 = arith.constant 0 : i32
    return %c0_i32, %c0_i32_0 : i32, i32
  }
  func.func @transform_3(%arg0: i32) -> (i32, i32) {
    %c0_i32 = arith.constant 0 : i32
    %c0_i32_0 = arith.constant 0 : i32
    %c0_i32_1 = arith.constant 0 : i32
    return %c0_i32, %c0_i32_0 : i32, i32
  }
  func.func @transform_4(%arg0: i32) -> (i32, i32) {
    %c0_i32 = arith.constant 0 : i32
    %c0_i32_0 = arith.constant 0 : i32
    %c0_i32_1 = arith.constant 0 : i32
    return %c0_i32, %c0_i32_0 : i32, i32
  }
  func.func @transform_5(%arg0: i32) -> (i32, i32) {
    %c0_i32 = arith.constant 0 : i32
    %c0_i32_0 = arith.constant 0 : i32
    return %arg0, %c0_i32 : i32, i32
  }
}

</mosaic_0001>

<bundles_post_ra>
// kernel: mlp_block_forward.1
= control target key start
LH: loop header
LB: loop body
LE: loop exit
PB: predicated region body
PF: predicated region fallthrough
CT: control target
= control target key end

     0   :  { %10 = vsyncpa [#allocation4], 0  ;;  %s2692_s0 = inlined_call_operand.vmem [shape: f32[1,1024], index: 0, kind: input, shape index: {}]   ;;  %s2693_s1 = inlined_call_operand.hbm [shape: f32[9,1024], index: 1, kind: input, shape index: {}]   ;;  %s2694_s2 = inlined_call_operand.vmem [shape: f32[8,5], index: 2, kind: input, shape index: {}]   ;;  %s2695_s3 = inlined_call_operand.vmem [shape: f32[4,256], index: 3, kind: input, shape index: {}]   ;;  %s2696_s4 = inlined_call_operand.hbm [shape: bf16[592,256], index: 4, kind: input, shape index: {}]   ;;  %s2697_s5 = inlined_call_operand.vmem [shape: f32[8,128], index: 5, kind: output, shape index: {}]  }
   0x1   :  { %11 = vsyncpa [#allocation6], 0  ;;  %s1907_s18 = smov [#allocation3]  }
   0x2   :  { %s19_s19 = sshll.u32 %s1907_s18, 4  ;;  %s20_s19 = int_to_ptr.vmem [resolvable:$true] %s19_s19 }
   0x3   :  { %s1871_s20 = scalar_lea.vmem %s20_s19, 2048  ;;  %p1876_p1 = scmp.lt.s32.totalorder %s20_s19, %s20_s19 }
   0x4   :  { %p1872_p0 = scmp.ne.s32.totalorder %s20_s19, %s1871_s20  ;;  %p1877_p2 = scmp.lt.s32.totalorder %s1871_s20, %s1871_s20 }
   0x6   :  { %p1878_p3 = por %p1877_p2, %p1876_p1 }
   0x8   :  { %p1879_p4 = pnand %p1878_p3, %p1872_p0 }
   0xa   :  { %1882 = shalt.err (!%p1879_p4)
}
   0xb   :  { %s1908_s21 = smov 1024   ;;  %s1909_s22 = smov 64  }
   0xc   :  { %25 = dma.hbm_to_vmem [thread:$0]  %s2693_s1, 2048, %s20_s19, [#allocation4], %s1908_s21, %s1908_s21, %s1909_s22  }
   0xd   :  { %s1910_s25 = smov [#allocation5]  }
   0xe   :  { %s35_s26 = sshll.u32 %s1910_s25, 4  ;;  %s36_s26 = int_to_ptr.vmem [resolvable:$true] %s35_s26 }
   0xf   :  { %s1891_s27 = scalar_lea.vmem %s36_s26, 9472  ;;  %p1896_p6 = scmp.lt.s32.totalorder %s36_s26, %s36_s26 }
  0x10   :  { %p1892_p5 = scmp.ne.s32.totalorder %s36_s26, %s1891_s27  ;;  %p1897_p7 = scmp.lt.s32.totalorder %s1891_s27, %s1891_s27 }
  0x12   :  { %p1898_p8 = por %p1897_p7, %p1896_p6 }
  0x14   :  { %p1899_p9 = pnand %p1898_p8, %p1892_p5 }
  0x16   :  { %1902 = shalt.err (!%p1899_p9)
}
  0x17   :  { %s1911_s28 = smov 128   ;;  %s1912_s29 = smov 8  }
  0x18   :  { %41 = dma.hbm_to_vmem [thread:$0]  %s2696_s4, 9472, %s36_s26, [#allocation6], %s1911_s28, %s1911_s28, %s1912_s29  }
  0x19   :  { %1903 = dma.done.wait [#allocation4], 2048  }
  0x1a   :  { %1904 = vsyncadd [#allocation4], 4294965248 }
  0x1b   :  { %1905 = dma.done.wait [#allocation6], 9472  }
  0x1c   :  { %1906 = vsyncadd [#allocation6], 4294957824  ;;  %v2700_v0 = vmov 0   ;;  %v1970_v1 = vld [vmem:[%s2694_s2] sm:$0xff]  ;;  %v1914_v2 = vmov 1   ;;  %v53_v3 = vlaneseq  ;;  %s1916_s9 = smov 113  }
  0x1d   :  { %1801 = vset.pattern.permute.xlu0 %v2700_v0  ;;  %885 = vmatprep.mubr.bf16.mxu0 %v2700_v0  ;;  %v1986_v7 = vld [vmem:[%s2692_s0] sm:$0xff]  ;;  %s1915_s0 = smov 111   ;;  %s1917_s10 = smov 112   ;;  %v2698_v62 = vmov 0.0   ;;  %vm849_vm8 = vcmask 654336   ;;  %vm1927_vm9 = vmmov 0  }
  0x1e   :  { %926 = vmatprep.mubr.bf16.mxu1 %v2700_v0  ;;  %95 = vperm.xlu0 %1801, %v1970_v1   ;;  %v1975_v4 = vshrl.u32 %v53_v3, 7  ;;  %s1918_s11 = smov 127   ;;  %s1919_s12 = smov 15   ;;  %v752_v48 = vld [vmem:[#allocation3 + $0x40] ss:$8 sm:$0xf] }
  0x1f   :  { %s1920_s13 = smov 1   ;;  %s1921_s14 = smov 17   ;;  %v753_v49 = vld [vmem:[#allocation3 + $0x40] ss:$8 sm:$0xf0]  ;;  %v2197_v50 = vand.u32 127, %v53_v3 }
  0x20   :  { %v1978_v5 = vsub.s32 1, %v1975_v4  ;;  %v1981_v6 = vsub.s32 4, %v1975_v4  ;;  %v1989_v8 = vsub.s32 2, %v1975_v4  ;;  %v2002_v12 = vsub.s32 3, %v1975_v4  ;;  %s1922_s15 = smov 16  }
  0x21   :  { %v2015_v17 = vsub.s32 0, %v1975_v4  ;;  %v2085_v33 = vsub.s32 7, %v1975_v4  ;;  %v2121_v38 = vsub.s32 6, %v1975_v4  ;;  %v2128_v39 = vsub.s32 5, %v1975_v4 }
  0x22   :  { %1802 = vset.pattern.permute.xlu0 %v1914_v2  ;;  %2708 = vst [vmem:[#allocation9_spill] sm:$0xff] %v1978_v5  ;;  %v1995_v10 = vrot.slane %v1986_v7, %v1978_v5  ;;  %v1999_v11 = vrot.slane %v1986_v7, %v1981_v6  ;;  %v2006_v13 = vrot.slane %v1986_v7, %v1989_v8  ;;  %vm742_vm0 = vcmp.lt.s32.totalorder %v2197_v50, 111 }
  0x23   :  { %107 = vperm.xlu0 %1802, %v1970_v1   ;;  %2710 = vst [vmem:[#allocation11_spill] sm:$0xff] %v2015_v17  ;;  %v2019_v18 = vrot.slane %v1986_v7, %v2002_v12  ;;  %v2032_v25 = vrot.slane %v1986_v7, %v2015_v17  ;;  %v2093_v34 = vrot.slane %v1986_v7, %v2085_v33  ;;  %vm586_vm1 = vcmp.lt.s32.totalorder %v2197_v50, 113 }
  0x24   :  { %2709 = vst [vmem:[#allocation10_spill] sm:$0xff] %v1999_v11  ;;  %v2132_v40 = vrot.slane %v1986_v7, %v2121_v38  ;;  %v2140_v41 = vrot.slane %v1986_v7, %v2128_v39  ;;  %v2199_v51 = vor.u32 %v753_v49, %v752_v48  ;;  %vm664_vm2 = vcmp.lt.s32.totalorder %v2197_v50, 112 }
  0x25   :  { %2711 = vst [vmem:[#allocation12_spill] sm:$0xff] %v2093_v34  ;;  %vm508_vm3 = vcmp.lt.s32.totalorder %v2197_v50, 127  ;;  %vm299_vm4 = vcmp.lt.s32.totalorder %v2197_v50, 15  ;;  %vm377_vm5 = vcmp.lt.s32.totalorder %v2197_v50, 1  ;;  %vm144_vm6 = vcmp.lt.s32.totalorder %v2197_v50, 17 }
  0x26   :  { %2712 = vst [vmem:[#allocation13_spill] sm:$0xff] %v2132_v40  ;;  %2713 = vst [vmem:[#allocation14_spill] sm:$0xff] %v2140_v41  ;;  %v763_v54 = vrot.slane %v2199_v51, %v1978_v5  ;;  %v767_v58 = vrot.slane %v2199_v51, %v1989_v8  ;;  %v771_v60 = vrot.slane %v2199_v51, %v2002_v12  ;;  %vm221_vm7 = vcmp.lt.s32.totalorder %v2197_v50, 16  ;;  %v1809_v50 = vld [vmem:[#allocation5 + $0x84] ss:$8 sps:$4 sm:$0xff]  }
  0x27   :  { %v759_v7 = vrot.slane %v2199_v51, %v2015_v17  ;;  %vm1600_vm10 = vcmask 523264  }
  0x99   :  { %v1991_v9 = vpop.permute.xlu0 %95 }
  0x9a   :  { %v99_v14 = vmul.f32 %v1991_v9, %v1995_v10  ;;  %v102_v15 = vmul.f32 %v1991_v9, %v1999_v11  ;;  %v100_v19 = vmul.f32 %v1991_v9, %v2006_v13  ;;  %v101_v26 = vmul.f32 %v1991_v9, %v2019_v18 }
  0x9b   :  { %v98_v29 = vmul.f32 %v1991_v9, %v2032_v25  ;;  %v105_v35 = vmul.f32 %v1991_v9, %v2093_v34  ;;  %v104_v42 = vmul.f32 %v1991_v9, %v2132_v40  ;;  %v103_v44 = vmul.f32 %v1991_v9, %v2140_v41 }
  0x9e   :  { %v2012_v16 = vpop.permute.xlu0 %107 }
  0x9f   :  { %v111_v20 = vadd.f32 %v2012_v16, %v99_v14  ;;  %v114_v21 = vadd.f32 %v2012_v16, %v102_v15  ;;  %v112_v22 = vadd.f32 %v2012_v16, %v100_v19  ;;  %v113_v27 = vadd.f32 %v2012_v16, %v101_v26 }
  0xa0   :  { %v110_v30 = vadd.f32 %v2012_v16, %v98_v29  ;;  %v117_v36 = vadd.f32 %v2012_v16, %v105_v35  ;;  %v116_v43 = vadd.f32 %v2012_v16, %v104_v42  ;;  %v115_v45 = vadd.f32 %v2012_v16, %v103_v44  ;;  %v674_v35 = vld [vmem:[#allocation3 + $0x7] ss:$8 sm:$0xf] }
  0xa1   :  { %v2026_v23 = vmax.f32 %v111_v20, 0.0  ;;  %v2028_v24 = vmax.f32 %v114_v21, 0.0  ;;  %v2041_v28 = vmax.f32 %v112_v22, 0.0  ;;  %v2050_v31 = vmax.f32 %v113_v27, 0.0 }
  0xa2   :  { %v2056_v32 = vmax.f32 %v110_v30, 0.0  ;;  %v2108_v37 = vmax.f32 %v117_v36, 0.0  ;;  %v2154_v46 = vmax.f32 %v116_v43, 0.0  ;;  %v2160_v47 = vmax.f32 %v115_v45, 0.0 }
  0xa3   :  { %728 = vrot.lane.b32.xlu1 %v2026_v23, %s1915_s0  ;;  %734 = vrot.lane.b32.xlu0 %v2028_v24, %s1915_s0  ;;  %v1924_v15 = vmov 2   ;;  %v1925_v16 = vmov 3   ;;  %v596_v27 = vld [vmem:[#allocation3 + $0x6] ss:$8 sm:$0xf]  ;;  %v1926_v44 = vmov 4  }
  0xa4   :  { %1803 = vset.pattern.permute.xlu1 %v1924_v15  ;;  %1804 = vset.pattern.permute.xlu0 %v1925_v16  ;;  %v597_v30 = vld [vmem:[#allocation3 + $0x6] ss:$8 sm:$0xf0]  ;;  %v675_v36 = vld [vmem:[#allocation3 + $0x7] ss:$8 sm:$0xf0] }
  0xa5   :  { %v2247_v48 = vor.u32 %v597_v30, %v596_v27  ;;  %v2249_v49 = vor.u32 %v675_v36, %v674_v35 }
  0xa7   :  { %730 = vrot.lane.b32.xlu1 %v2041_v28, %s1915_s0  ;;  %572 = vrot.lane.b32.xlu0 %v2026_v23, %s1916_s9  ;;  %v693_v16 = vrot.slane %v2249_v49, %v2002_v12 }
  0xab   :  { %732 = vrot.lane.b32.xlu1 %v2050_v31, %s1915_s0  ;;  %576 = vrot.lane.b32.xlu0 %v2050_v31, %s1916_s9 }
  0xaf   :  { %726 = vrot.lane.b32.xlu1 %v2056_v32, %s1915_s0  ;;  %650 = vrot.lane.b32.xlu0 %v2026_v23, %s1917_s10 }
  0xb3   :  { %574 = vrot.lane.b32.xlu1 %v2041_v28, %s1916_s9  ;;  %654 = vrot.lane.b32.xlu0 %v2050_v31, %s1917_s10 }
  0xb7   :  { %578 = vrot.lane.b32.xlu1 %v2028_v24, %s1916_s9  ;;  %570 = vrot.lane.b32.xlu0 %v2056_v32, %s1916_s9 }
  0xbb   :  { %652 = vrot.lane.b32.xlu1 %v2041_v28, %s1917_s10  ;;  %494 = vrot.lane.b32.xlu0 %v2026_v23, %s1918_s11 }
  0xbf   :  { %656 = vrot.lane.b32.xlu1 %v2028_v24, %s1917_s10  ;;  %498 = vrot.lane.b32.xlu0 %v2050_v31, %s1918_s11 }
  0xc3   :  { %648 = vrot.lane.b32.xlu1 %v2056_v32, %s1917_s10  ;;  %492 = vrot.lane.b32.xlu0 %v2056_v32, %s1918_s11 }
  0xc7   :  { %496 = vrot.lane.b32.xlu1 %v2041_v28, %s1918_s11  ;;  %285 = vrot.lane.b32.xlu0 %v2026_v23, %s1919_s12 }
  0xcb   :  { %500 = vrot.lane.b32.xlu1 %v2028_v24, %s1918_s11  ;;  %289 = vrot.lane.b32.xlu0 %v2050_v31, %s1919_s12 }
  0xcf   :  { %283 = vrot.lane.b32.xlu1 %v2056_v32, %s1919_s12  ;;  %363 = vrot.lane.b32.xlu0 %v2026_v23, %s1920_s13 }
  0xd3   :  { %287 = vrot.lane.b32.xlu1 %v2041_v28, %s1919_s12  ;;  %367 = vrot.lane.b32.xlu0 %v2050_v31, %s1920_s13 }
  0xd7   :  { %361 = vrot.lane.b32.xlu1 %v2056_v32, %s1920_s13  ;;  %375 = vrot.lane.b32.xlu0 %v2108_v37, %s1920_s13 }
  0xdb   :  { %365 = vrot.lane.b32.xlu1 %v2041_v28, %s1920_s13  ;;  %128 = vrot.lane.b32.xlu0 %v2026_v23, %s1921_s14 }
  0xdf   :  { %297 = vrot.lane.b32.xlu1 %v2108_v37, %s1919_s12  ;;  %132 = vrot.lane.b32.xlu0 %v2050_v31, %s1921_s14 }
  0xe3   :  { %126 = vrot.lane.b32.xlu1 %v2056_v32, %s1921_s14  ;;  %207 = vrot.lane.b32.xlu0 %v2026_v23, %s1922_s15 }
  0xe7   :  { %130 = vrot.lane.b32.xlu1 %v2041_v28, %s1921_s14  ;;  %211 = vrot.lane.b32.xlu0 %v2050_v31, %s1922_s15 }
  0xeb   :  { %205 = vrot.lane.b32.xlu1 %v2056_v32, %s1922_s15  ;;  %219 = vrot.lane.b32.xlu0 %v2108_v37, %s1922_s15 }
  0xef   :  { %209 = vrot.lane.b32.xlu1 %v2041_v28, %s1922_s15  ;;  %738 = vrot.lane.b32.xlu0 %v2154_v46, %s1915_s0 }
  0xf3   :  { %140 = vrot.lane.b32.xlu1 %v2108_v37, %s1921_s14  ;;  %580 = vrot.lane.b32.xlu0 %v2160_v47, %s1916_s9 }
  0xf7   :  { %736 = vrot.lane.b32.xlu1 %v2160_v47, %s1915_s0  ;;  %584 = vrot.lane.b32.xlu0 %v2108_v37, %s1916_s9 }
  0xfb   :  { %740 = vrot.lane.b32.xlu1 %v2108_v37, %s1915_s0  ;;  %660 = vrot.lane.b32.xlu0 %v2154_v46, %s1917_s10 }
  0xff   :  { %582 = vrot.lane.b32.xlu1 %v2154_v46, %s1916_s9  ;;  %502 = vrot.lane.b32.xlu0 %v2160_v47, %s1918_s11 }
 0x103   :  { %658 = vrot.lane.b32.xlu1 %v2160_v47, %s1917_s10  ;;  %506 = vrot.lane.b32.xlu0 %v2108_v37, %s1918_s11 }
 0x107   :  { %662 = vrot.lane.b32.xlu1 %v2108_v37, %s1917_s10  ;;  %293 = vrot.lane.b32.xlu0 %v2160_v47, %s1919_s12 }
 0x10b   :  { %504 = vrot.lane.b32.xlu1 %v2154_v46, %s1918_s11  ;;  %369 = vrot.lane.b32.xlu0 %v2028_v24, %s1920_s13 }
 0x10f   :  { %291 = vrot.lane.b32.xlu1 %v2028_v24, %s1919_s12  ;;  %373 = vrot.lane.b32.xlu0 %v2154_v46, %s1920_s13 }
 0x113   :  { %295 = vrot.lane.b32.xlu1 %v2154_v46, %s1919_s12  ;;  %136 = vrot.lane.b32.xlu0 %v2160_v47, %s1921_s14 }
 0x115   :  { %v729_v52 = vpop.permute.xlu1 %728  ;;  %v2203_v53 = vpop.permute.xlu0 %734 }
 0x117   :  { %371 = vrot.lane.b32.xlu1 %v2160_v47, %s1920_s13  ;;  %213 = vrot.lane.b32.xlu0 %v2028_v24, %s1922_s15 }
 0x119   :  { %v731_v55 = vpop.permute.xlu1 %730  ;;  %v2212_v56 = vpop.permute.xlu0 %572 }
 0x11a   :  { %v748_v57 = vsel %vm742_vm0, %v729_v52, %v731_v55 }
 0x11b   :  { %134 = vrot.lane.b32.xlu1 %v2028_v24, %s1921_s14  ;;  %v797_v59 = vmul.f32 %v763_v54, %v748_v57  ;;  %217 = vrot.lane.b32.xlu0 %v2154_v46, %s1922_s15  ;;  %v51_v54 = vld [vmem:[%s2694_s2] sm:$0x1]  ;;  %v607_v57 = vrot.slane %v2247_v48, %v1978_v5 }
 0x11d   :  { %v733_v61 = vpop.permute.xlu1 %732  ;;  %v837_v63 = vpack.c.bf16 %v2698_v62, %v797_v59  ;;  %v577_v2 = vpop.permute.xlu0 %576 }
 0x11e   :  { %v746_v3 = vsel %vm742_vm0, %v733_v61, %v2203_v53  ;;  %v747_v4 = vsel %vm742_vm0, %v731_v55, %v733_v61 }
 0x11f   :  { %v798_v9 = vmul.f32 %v767_v58, %v747_v4  ;;  %859 = vmatprep.subr.bf16.mxu0 %v837_v63  ;;  %138 = vrot.lane.b32.xlu1 %v2154_v46, %s1921_s14  ;;  %v799_v14 = vmul.f32 %v771_v60, %v746_v3  ;;  %v685_v58 = vrot.slane %v2249_v49, %v1978_v5  ;;  %v440_v4 = vld [vmem:[#allocation3 + $0x4] ss:$8 sm:$0xf] }
 0x120   :  { %1026 = vperm.xlu0 %1804, %v1970_v1   ;;  %v615_v60 = vrot.slane %v2247_v48, %v2002_v12  ;;  %v689_v63 = vrot.slane %v2249_v49, %v1989_v8 }
 0x121   :  { %v2234_v19 = vpop.permute.xlu1 %726  ;;  %v839_v20 = vpack.c.bf16 %v2698_v62, %v799_v14  ;;  %v838_v21 = vpack.c.bf16 %v2698_v62, %v798_v9  ;;  %v2239_v22 = vpop.permute.xlu0 %650 }
 0x122   :  { %v749_v26 = vsel %vm742_vm0, %v2234_v19, %v729_v52 }
 0x123   :  { %v796_v29 = vmul.f32 %v759_v7, %v749_v26  ;;  %900 = vmatprep.subr.bf16.mxu1 %v839_v20  ;;  %215 = vrot.lane.b32.xlu1 %v2160_v47, %s1922_s15  ;;  %v441_v7 = vld [vmem:[#allocation3 + $0x4] ss:$8 sm:$0xf0]  ;;  %v518_v20 = vld [vmem:[#allocation3 + $0x5] ss:$8 sm:$0xf]  ;;  %v611_v26 = vrot.slane %v2247_v48, %v1989_v8 }
 0x124   :  { %901 = vmatpush1.bf16.msra.mxu1 %v838_v21  ;;  %1806 = vset.pattern.permute.xlu0 %v1926_v44  ;;  %v519_v21 = vld [vmem:[#allocation3 + $0x5] ss:$8 sm:$0xf0] }
 0x125   :  { %v575_v42 = vpop.permute.xlu1 %574  ;;  %v836_v43 = vpack.c.bf16 %v2698_v62, %v796_v29  ;;  %v655_v45 = vpop.permute.xlu0 %654 }
 0x126   :  { %v591_v29 = vsel %vm586_vm1, %v575_v42, %v577_v2 }
 0x127   :  { %860 = vmatpush1.bf16.msra.mxu0 %v836_v43  ;;  %846 = vperm.xlu1 %1803, %v1970_v1   ;;  %v592_v1 = vsel %vm586_vm1, %v2212_v56, %v575_v42  ;;  %v642_v42 = vmul.f32 %v611_v26, %v591_v29 }
 0x128   :  { %v641_v9 = vmul.f32 %v607_v57, %v592_v1  ;;  %v2293_v57 = vor.u32 %v441_v7, %v440_v4 }
 0x129   :  { %v2253_v52 = vpop.permute.xlu1 %578  ;;  %v2258_v55 = vpop.permute.xlu0 %570 }
 0x12a   :  { %v590_v27 = vsel %vm586_vm1, %v577_v2, %v2253_v52  ;;  %v681_v2 = vrot.slane %v2249_v49, %v2015_v17 }
 0x12b   :  { %1805 = vset.pattern.permute.xlu1 %v1926_v44  ;;  %v643_v1 = vmul.f32 %v615_v60, %v590_v27 }
 0x12c   :  { %1087 = vperm.xlu1 %1805, %v51_v54   ;;  %v2291_v54 = vor.u32 %v519_v21, %v518_v20  ;;  %v447_v21 = vrot.slane %v2293_v57, %v2015_v17 }
 0x12d   :  { %v653_v59 = vpop.permute.xlu1 %652  ;;  %v495_v61 = vpop.permute.xlu0 %494 }
 0x12e   :  { %v670_v3 = vsel %vm664_vm2, %v2239_v22, %v653_v59  ;;  %v669_v14 = vsel %vm664_vm2, %v653_v59, %v655_v45  ;;  %v525_v4 = vrot.slane %v2291_v54, %v2015_v17  ;;  %v529_v20 = vrot.slane %v2291_v54, %v1978_v5 }
 0x12f   :  { %v719_v15 = vmul.f32 %v685_v58, %v670_v3  ;;  %v720_v36 = vmul.f32 %v689_v63, %v669_v14  ;;  %v603_v58 = vrot.slane %v2247_v48, %v2015_v17  ;;  %v593_v63 = vsel %vm586_vm1, %v2258_v55, %v2212_v56 }
 0x130   :  { %v451_v14 = vrot.slane %v2293_v57, %v1978_v5 }
 0x131   :  { %v2286_v30 = vpop.permute.xlu1 %656  ;;  %v829_v35 = vpack.c.bf16 %v719_v15, %v641_v9  ;;  %v499_v43 = vpop.permute.xlu0 %498  ;;  %v830_v9 = vpack.c.bf16 %v720_v36, %v642_v42  ;;  %v640_v56 = vmul.f32 %v603_v58, %v593_v63  ;;  %v484_v42 = vmul.f32 %v447_v21, %v2056_v32  ;;  %v388_v21 = vld [vmem:[#allocation3 + $0x3] ss:$8 sm:$0xf0] }
 0x132   :  { %v668_v44 = vsel %vm664_vm2, %v655_v45, %v2286_v30  ;;  %v455_v63 = vrot.slane %v2293_v57, %v1989_v8 }
 0x133   :  { %v721_v59 = vmul.f32 %v693_v16, %v668_v44  ;;  %861 = vmatprep.subr.bf16.mxu0 %v829_v35  ;;  %v533_v35 = vrot.slane %v2291_v54, %v1989_v8  ;;  %v459_v44 = vrot.slane %v2293_v57, %v2002_v12 }
 0x135   :  { %v2304_v45 = vpop.permute.xlu1 %648  ;;  %v831_v3 = vpack.c.bf16 %v721_v59, %v643_v1  ;;  %v2308_v60 = vpop.permute.xlu0 %492  ;;  %v537_v59 = vrot.slane %v2291_v54, %v2002_v12  ;;  %v487_v32 = vmul.f32 %v459_v44, %v2050_v31 }
 0x136   :  { %v671_v7 = vsel %vm664_vm2, %v2304_v45, %v2239_v22  ;;  %v515_v15 = vsel %vm508_vm3, %v2308_v60, %v495_v61 }
 0x137   :  { %v718_v16 = vmul.f32 %v681_v2, %v671_v7  ;;  %902 = vmatprep.subr.bf16.mxu1 %v831_v3  ;;  %v562_v27 = vmul.f32 %v525_v4, %v515_v15  ;;  %v485_v2 = vmul.f32 %v451_v14, %v2026_v23  ;;  %v310_v23 = vld [vmem:[#allocation3 + $0x2] ss:$8 sm:$0xf0]  ;;  %v486_v14 = vmul.f32 %v455_v63, %v2041_v28 }
 0x138   :  { %903 = vmatpush1.bf16.msra.mxu1 %v830_v9 }
 0x139   :  { %v497_v26 = vpop.permute.xlu1 %496  ;;  %v828_v22 = vpack.c.bf16 %v718_v16, %v640_v56  ;;  %v286_v29 = vpop.permute.xlu0 %285  ;;  %v820_v56 = vpack.c.bf16 %v562_v27, %v484_v42  ;;  %v309_v16 = vld [vmem:[#allocation3 + $0x2] ss:$8 sm:$0xf] }
 0x13a   :  { %v514_v36 = vsel %vm508_vm3, %v495_v61, %v497_v26  ;;  %v513_v58 = vsel %vm508_vm3, %v497_v26, %v499_v43 }
 0x13b   :  { %v563_v1 = vmul.f32 %v529_v20, %v514_v36  ;;  %862 = vmatpush1.bf16.msra.mxu0 %v828_v22  ;;  %v564_v4 = vmul.f32 %v533_v35, %v513_v58  ;;  %v387_v20 = vld [vmem:[#allocation3 + $0x3] ss:$8 sm:$0xf]  ;;  %v2346_v58 = vor.u32 %v310_v23, %v309_v16 }
 0x13d   :  { %v2337_v3 = vpop.permute.xlu1 %500  ;;  %v821_v61 = vpack.c.bf16 %v563_v1, %v485_v2  ;;  %v2339_v7 = vpop.permute.xlu0 %289  ;;  %v822_v36 = vpack.c.bf16 %v564_v4, %v486_v14  ;;  %v320_v28 = vrot.slane %v2346_v58, %v1978_v5  ;;  %v324_v2 = vrot.slane %v2346_v58, %v1989_v8 }
 0x13e   :  { %v512_v9 = vsel %vm508_vm3, %v499_v43, %v2337_v3  ;;  %v2348_v43 = vor.u32 %v388_v21, %v387_v20  ;;  %v328_v42 = vrot.slane %v2346_v58, %v2002_v12 }
 0x13f   :  { %v565_v15 = vmul.f32 %v537_v59, %v512_v9  ;;  %863 = vmatprep.subr.bf16.mxu0 %v821_v61 }
 0x140   :  { %864 = vmatpush1.bf16.msra.mxu0 %v820_v56  ;;  %v398_v31 = vrot.slane %v2348_v43, %v1978_v5  ;;  %v402_v56 = vrot.slane %v2348_v43, %v1989_v8  ;;  %v394_v20 = vrot.slane %v2348_v43, %v2015_v17 }
 0x141   :  { %v284_v26 = vpop.permute.xlu1 %283  ;;  %v823_v22 = vpack.c.bf16 %v565_v15, %v487_v32  ;;  %v364_v35 = vpop.permute.xlu0 %363  ;;  %v406_v15 = vrot.slane %v2348_v43, %v2002_v12 }
 0x142   :  { %v306_v44 = vsel %vm299_vm4, %v284_v26, %v286_v29 }
 0x143   :  { %904 = vmatprep.subr.bf16.mxu1 %v823_v22  ;;  %v354_v4 = vmul.f32 %v320_v28, %v306_v44  ;;  %v316_v28 = vrot.slane %v2346_v58, %v2015_v17 }
 0x144   :  { %905 = vmatpush1.bf16.msra.mxu1 %v822_v36 }
 0x145   :  { %v288_v27 = vpop.permute.xlu1 %287  ;;  %v2351_v1 = vpop.permute.xlu0 %367 }
 0x146   :  { %v304_v16 = vsel %vm299_vm4, %v288_v27, %v2339_v7  ;;  %v305_v23 = vsel %vm299_vm4, %v286_v29, %v288_v27 }
 0x147   :  { %v356_v44 = vmul.f32 %v328_v42, %v304_v16  ;;  %v153_v42 = vld [vmem:[#allocation3] ss:$8 sm:$0xf]  ;;  %v232_v16 = vld [vmem:[#allocation3 + $0x1] ss:$8 sm:$0xf0] }
 0x149   :  { %v362_v59 = vpop.permute.xlu1 %361  ;;  %v2364_v63 = vpop.permute.xlu0 %375 }
 0x14a   :  { %v384_v61 = vsel %vm377_vm5, %v362_v59, %v364_v35  ;;  %v385_v27 = vsel %vm377_vm5, %v2364_v63, %v362_v59 }
 0x14b   :  { %v432_v9 = vmul.f32 %v398_v31, %v384_v61  ;;  %v355_v31 = vmul.f32 %v324_v2, %v305_v23 }
 0x14d   :  { %v366_v32 = vpop.permute.xlu1 %365  ;;  %v813_v14 = vpack.c.bf16 %v432_v9, %v354_v4  ;;  %v129_v21 = vpop.permute.xlu0 %128 }
 0x14e   :  { %v382_v22 = vsel %vm377_vm5, %v366_v32, %v2351_v1  ;;  %v383_v36 = vsel %vm377_vm5, %v364_v35, %v366_v32  ;;  %v431_v32 = vmul.f32 %v394_v20, %v385_v27 }
 0x14f   :  { %v433_v61 = vmul.f32 %v402_v56, %v383_v36  ;;  %v434_v29 = vmul.f32 %v406_v15, %v382_v22  ;;  %865 = vmatprep.subr.bf16.mxu0 %v813_v14  ;;  %v154_v56 = vld [vmem:[#allocation3] ss:$8 sm:$0xf0]  ;;  %v231_v15 = vld [vmem:[#allocation3 + $0x1] ss:$8 sm:$0xf] }
 0x150   :  { %v2396_v22 = vor.u32 %v154_v56, %v153_v42  ;;  %v2398_v36 = vor.u32 %v232_v16, %v231_v15 }
 0x151   :  { %v2389_v4 = vpop.permute.xlu1 %297  ;;  %v815_v9 = vpack.c.bf16 %v434_v29, %v356_v44  ;;  %v814_v62 = vpack.c.bf16 %v433_v61, %v355_v31  ;;  %v2391_v0 = vpop.permute.xlu0 %132 }
 0x152   :  { %v307_v35 = vsel %vm299_vm4, %v2389_v4, %v284_v26  ;;  %v164_v20 = vrot.slane %v2396_v22, %v1978_v5  ;;  %v168_v61 = vrot.slane %v2396_v22, %v1989_v8  ;;  %v172_v29 = vrot.slane %v2396_v22, %v2002_v12 }
 0x153   :  { %v353_v2 = vmul.f32 %v316_v28, %v307_v35  ;;  %906 = vmatprep.subr.bf16.mxu1 %v815_v9  ;;  %v250_v42 = vrot.slane %v2398_v36, %v2002_v12 }
 0x154   :  { %907 = vmatpush1.bf16.msra.mxu1 %v814_v62  ;;  %v242_v62 = vrot.slane %v2398_v36, %v1978_v5  ;;  %v238_v5 = vrot.slane %v2398_v36, %v2015_v17 }
 0x155   :  { %v127_v23 = vpop.permute.xlu1 %126  ;;  %v812_v59 = vpack.c.bf16 %v431_v32, %v353_v2  ;;  %v208_v14 = vpop.permute.xlu0 %207  ;;  %v246_v2 = vrot.slane %v2398_v36, %v1989_v8 }
 0x156   :  { %v151_v28 = vsel %vm144_vm6, %v127_v23, %v129_v21 }
 0x157   :  { %866 = vmatpush1.bf16.msra.mxu0 %v812_v59  ;;  %v198_v35 = vmul.f32 %v164_v20, %v151_v28 }
 0x159   :  { %v131_v31 = vpop.permute.xlu1 %130  ;;  %v2401_v26 = vpop.permute.xlu0 %211 }
 0x15a   :  { %v149_v56 = vsel %vm144_vm6, %v131_v31, %v2391_v0  ;;  %v150_v15 = vsel %vm144_vm6, %v129_v21, %v131_v31 }
 0x15b   :  { %v199_v28 = vmul.f32 %v168_v61, %v150_v15  ;;  %v775_v61 = vrot.slane %v2199_v51, %v1981_v6 }
 0x15d   :  { %v206_v44 = vpop.permute.xlu1 %205  ;;  %v2414_v27 = vpop.permute.xlu0 %219 }
 0x15e   :  { %v228_v9 = vsel %vm221_vm7, %v206_v44, %v208_v14  ;;  %v229_v31 = vsel %vm221_vm7, %v2414_v27, %v206_v44 }
 0x15f   :  { %v276_v32 = vmul.f32 %v242_v62, %v228_v9  ;;  %v160_v62 = vrot.slane %v2396_v22, %v2015_v17  ;;  %v200_v9 = vmul.f32 %v172_v29, %v149_v56  ;;  %v779_v29 = vrot.slane %v2199_v51, %v2128_v39  ;;  %v2455_v56 = vld [vmem:[#allocation5] sm:$0xf] }
 0x161   :  { %v210_v16 = vpop.permute.xlu1 %209  ;;  %v805_v59 = vpack.c.bf16 %v276_v32, %v198_v35  ;;  %v739_v20 = vpop.permute.xlu0 %738 }
 0x162   :  { %v226_v8 = vsel %vm221_vm7, %v210_v16, %v2401_v26  ;;  %v227_v12 = vsel %vm221_vm7, %v208_v14, %v210_v16  ;;  %v275_v16 = vmul.f32 %v238_v5, %v229_v31  ;;  %v783_v5 = vrot.slane %v2199_v51, %v2121_v38 }
 0x163   :  { %v277_v41 = vmul.f32 %v246_v2, %v227_v12  ;;  %v278_v21 = vmul.f32 %v250_v42, %v226_v8  ;;  %867 = vmatprep.subr.bf16.mxu0 %v805_v59  ;;  %v2715_v8 = vmov 0.0  }
 0x165   :  { %v2439_v35 = vpop.permute.xlu1 %140  ;;  %v807_v32 = vpack.c.bf16 %v278_v21, %v200_v9  ;;  %v806_v34 = vpack.c.bf16 %v277_v41, %v199_v28  ;;  %v581_v11 = vpop.permute.xlu0 %580 }
 0x166   :  { %v152_v14 = vsel %vm144_vm6, %v2439_v35, %v127_v23 }
 0x167   :  { %v197_v17 = vmul.f32 %v160_v62, %v152_v14  ;;  %908 = vmatprep.subr.bf16.mxu1 %v807_v32  ;;  %v463_v32 = vrot.slane %v2293_v57, %v1981_v6  ;;  %v541_v14 = vrot.slane %v2291_v54, %v1981_v6 }
 0x168   :  { %909 = vmatpush1.bf16.msra.mxu1 %v806_v34  ;;  %v2714_v34 = vmov 0  }
 0x169   :  { %v737_v44 = vpop.permute.xlu1 %736  ;;  %v804_v2 = vpack.c.bf16 %v275_v16, %v197_v17  ;;  %v585_v42 = vpop.permute.xlu0 %584  ;;  %v787_v17 = vrot.slane %v2199_v51, %v2085_v33 }
 0x16a   :  { %v744_v41 = vsel %vm742_vm0, %v737_v44, %v739_v20  ;;  %v745_v23 = vsel %vm742_vm0, %v2203_v53, %v737_v44  ;;  %v623_v44 = vrot.slane %v2247_v48, %v2128_v39 }
 0x16b   :  { %v800_v15 = vmul.f32 %v775_v61, %v745_v23  ;;  %v801_v59 = vmul.f32 %v779_v29, %v744_v41  ;;  %868 = vmatpush1.bf16.msra.mxu0 %v804_v2  ;;  %1661 = vmatmul.mubr.msk.bf16.vlgmr.msra.gmra.mxu1 %vm849_vm8, %v2455_v56  ;;  %v619_v61 = vrot.slane %v2247_v48, %v1981_v6 }
 0x16c   :  { %1008 = vmatprep.mubr.bf16.mxu1 %v2714_v34  ;;  %v471_v2 = vrot.slane %v2293_v57, %v2121_v38  ;;  %v475_v41 = vrot.slane %v2293_v57, %v2085_v33  ;;  %v589_v23 = vsel %vm586_vm1, %v2253_v52, %v581_v11  ;;  %v553_v52 = vrot.slane %v2291_v54, %v2085_v33 }
 0x16d   :  { %v840_v12 = vpack.c.bf16 %v2715_v8, %v800_v15  ;;  %v741_v53 = vpop.permute.xlu1 %740  ;;  %v841_v62 = vpack.c.bf16 %v2715_v8, %v801_v59  ;;  %v661_v28 = vpop.permute.xlu0 %660  ;;  %v697_v15 = vrot.slane %v2249_v49, %v1981_v6  ;;  %v701_v59 = vrot.slane %v2249_v49, %v2128_v39 }
 0x16e   :  { %v743_v9 = vsel %vm742_vm0, %v739_v20, %v741_v53  ;;  %v750_v21 = vsel %vm742_vm0, %v741_v53, %v2234_v19  ;;  %1660 = vmatmul.mubr.msk.bf16.vlgmr.msra.gmra.mxu0 %vm849_vm8, %v2455_v56 }
 0x16f   :  { %v802_v51 = vmul.f32 %v783_v5, %v743_v9  ;;  %v803_v31 = vmul.f32 %v787_v17, %v750_v21  ;;  %941 = vmatprep.subr.bf16.mxu0 %v841_v62  ;;  %967 = vmatprep.mubr.bf16.mxu0 %v2714_v34  ;;  %v2497_v17 = vmul.f32 %v463_v32, %v2028_v24 }
 0x170   :  { %942 = vmatpush1.bf16.msra.mxu0 %v840_v12  ;;  %v627_v62 = vrot.slane %v2247_v48, %v2121_v38  ;;  %v705_v24 = vrot.slane %v2249_v49, %v2121_v38  ;;  %v709_v21 = vrot.slane %v2249_v49, %v2085_v33  ;;  %v594_v49 = vsel %vm586_vm1, %v585_v42, %v2258_v55 }
 0x171   :  { %v842_v20 = vpack.c.bf16 %v2715_v8, %v802_v51  ;;  %v583_v16 = vpop.permute.xlu1 %582  ;;  %v843_v19 = vpack.c.bf16 %v2715_v8, %v803_v31  ;;  %v503_v29 = vpop.permute.xlu0 %502  ;;  %v644_v51 = vmul.f32 %v619_v61, %v589_v23 }
 0x172   :  { %v511_v5 = vsel %vm508_vm3, %v2337_v3, %v503_v29  ;;  %v588_v53 = vsel %vm586_vm1, %v581_v11, %v583_v16  ;;  %v631_v3 = vrot.slane %v2247_v48, %v2085_v33  ;;  %v587_v61 = vsel %vm586_vm1, %v583_v16, %v585_v42 }
 0x173   :  { %982 = vmatprep.subr.bf16.mxu1 %v843_v19  ;;  %v2499_v12 = vmul.f32 %v541_v14, %v511_v5  ;;  %v645_v48 = vmul.f32 %v623_v44, %v588_v53  ;;  %v545_v44 = vrot.slane %v2291_v54, %v2128_v39 }
 0x174   :  { %983 = vmatpush1.bf16.msra.mxu1 %v842_v20  ;;  %v647_v16 = vmul.f32 %v631_v3, %v594_v49 }
 0x175   :  { %v659_v9 = vpop.permute.xlu1 %658  ;;  %v824_v11 = vpack.c.bf16 %v2499_v12, %v2497_v17  ;;  %v507_v31 = vpop.permute.xlu0 %506  ;;  %v491_v17 = vmul.f32 %v475_v41, %v2108_v37  ;;  %v549_v37 = vrot.slane %v2291_v54, %v2121_v38  ;;  %v646_v41 = vmul.f32 %v627_v62, %v587_v61 }
 0x176   :  { %v666_v32 = vsel %vm664_vm2, %v659_v9, %v661_v28  ;;  %v667_v14 = vsel %vm664_vm2, %v2286_v30, %v659_v9  ;;  %v516_v20 = vsel %vm508_vm3, %v507_v31, %v2308_v60  ;;  %v467_v60 = vrot.slane %v2293_v57, %v2128_v39 }
 0x177   :  { %v722_v19 = vmul.f32 %v697_v15, %v667_v14  ;;  %v723_v5 = vmul.f32 %v701_v59, %v666_v32  ;;  %v569_v23 = vmul.f32 %v553_v52, %v516_v20  ;;  %v490_v57 = vmul.f32 %v471_v2, %v2154_v46 }
 0x178   :  { %v332_v2 = vrot.slane %v2346_v58, %v1981_v6 }
 0x179   :  { %v832_v12 = vpack.c.bf16 %v722_v19, %v644_v51  ;;  %v663_v40 = vpop.permute.xlu1 %662  ;;  %v833_v30 = vpack.c.bf16 %v723_v5, %v645_v48  ;;  %v294_v15 = vpop.permute.xlu0 %293  ;;  %v827_v42 = vpack.c.bf16 %v569_v23, %v491_v17  ;;  %v344_v19 = vrot.slane %v2346_v58, %v2085_v33 }
 0x17a   :  { %v665_v59 = vsel %vm664_vm2, %v661_v28, %v663_v40  ;;  %v672_v55 = vsel %vm664_vm2, %v663_v40, %v2304_v45  ;;  %v410_v28 = vrot.slane %v2348_v43, %v1981_v6  ;;  %v489_v45 = vmul.f32 %v467_v60, %v2160_v47 }
 0x17b   :  { %v724_v53 = vmul.f32 %v705_v24, %v665_v59  ;;  %v725_v52 = vmul.f32 %v709_v21, %v672_v55  ;;  %943 = vmatprep.subr.bf16.mxu0 %v833_v30  ;;  %v340_v17 = vrot.slane %v2346_v58, %v2121_v38 }
 0x17c   :  { %944 = vmatpush1.bf16.msra.mxu0 %v832_v12 }
 0x17d   :  { %v834_v9 = vpack.c.bf16 %v724_v53, %v646_v41  ;;  %v505_v51 = vpop.permute.xlu1 %504  ;;  %v835_v32 = vpack.c.bf16 %v725_v52, %v647_v16  ;;  %v370_v14 = vpop.permute.xlu0 %369 }
 0x17e   :  { %v509_v40 = vsel %vm508_vm3, %v505_v51, %v507_v31  ;;  %v510_v54 = vsel %vm508_vm3, %v503_v29, %v505_v51  ;;  %v381_v3 = vsel %vm377_vm5, %v2351_v1, %v370_v14  ;;  %v422_v1 = vrot.slane %v2348_v43, %v2085_v33 }
 0x17f   :  { %v567_v62 = vmul.f32 %v545_v44, %v510_v54  ;;  %v568_v46 = vmul.f32 %v549_v37, %v509_v40  ;;  %984 = vmatprep.subr.bf16.mxu1 %v835_v32  ;;  %v435_v29 = vmul.f32 %v410_v28, %v381_v3  ;;  %v188_v32 = vrot.slane %v2396_v22, %v2085_v33 }
 0x180   :  { %985 = vmatpush1.bf16.msra.mxu1 %v834_v9  ;;  %v180_v54 = vrot.slane %v2396_v22, %v2128_v39 }
 0x181   :  { %v826_v24 = vpack.c.bf16 %v568_v46, %v490_v57  ;;  %986 = vmatprep.subr.bf16.mxu1 %v827_v42  ;;  %v292_v21 = vpop.permute.xlu1 %291  ;;  %v825_v31 = vpack.c.bf16 %v567_v62, %v489_v45  ;;  %v374_v48 = vpop.permute.xlu0 %373  ;;  %v184_v45 = vrot.slane %v2396_v22, %v2121_v38 }
 0x182   :  { %v303_v47 = vsel %vm299_vm4, %v2339_v7, %v292_v21  ;;  %v378_v5 = vsel %vm377_vm5, %v374_v48, %v2364_v63  ;;  %v336_v7 = vrot.slane %v2346_v58, %v2128_v39  ;;  %v414_v63 = vrot.slane %v2348_v43, %v2128_v39 }
 0x183   :  { %v357_v20 = vmul.f32 %v332_v2, %v303_v47  ;;  %945 = vmatprep.subr.bf16.mxu0 %v825_v31  ;;  %v438_v30 = vmul.f32 %v422_v1, %v378_v5  ;;  %v302_v60 = vsel %vm299_vm4, %v292_v21, %v294_v15  ;;  %v262_v2 = vrot.slane %v2398_v36, %v2121_v38 }
 0x184   :  { %946 = vmatpush1.bf16.msra.mxu0 %v824_v11  ;;  %987 = vmatpush1.bf16.msra.mxu1 %v826_v24  ;;  %v418_v11 = vrot.slane %v2348_v43, %v2121_v38  ;;  %v358_v16 = vmul.f32 %v336_v7, %v302_v60  ;;  %v254_v24 = vrot.slane %v2398_v36, %v1981_v6  ;;  %v1815_v7 = vld [vmem:[#allocation5 + $0x64] ss:$8 sps:$4 sm:$0xff]   ;;  %v1830_v60 = vld [vmem:[#allocation5 + $0x14] ss:$8 sps:$4 sm:$0xff]  }
 0x185   :  { %v816_v49 = vpack.c.bf16 %v435_v29, %v357_v20  ;;  %v296_v61 = vpop.permute.xlu1 %295  ;;  %v137_v23 = vpop.permute.xlu0 %136 }
 0x186   :  { %v300_v12 = vsel %vm299_vm4, %v296_v61, %v2389_v4  ;;  %v301_v59 = vsel %vm299_vm4, %v294_v15, %v296_v61  ;;  %v266_v15 = vrot.slane %v2398_v36, %v2085_v33  ;;  %v258_v33 = vrot.slane %v2398_v36, %v2128_v39  ;;  %v1810_v61 = vld [vmem:[#allocation5 + $0x70] ss:$8 sps:$4 sm:$0xff]  }
 0x187   :  { %v360_v44 = vmul.f32 %v344_v19, %v300_v12  ;;  %v359_v41 = vmul.f32 %v340_v17, %v301_v59  ;;  %v1818_v17 = vld [vmem:[#allocation5 + $0x54] ss:$8 sps:$4 sm:$0xff]   ;;  %v1816_v12 = vld [vmem:[#allocation5 + $0x50] ss:$8 sps:$4 sm:$0xff]  }
 0x188   :  { %v1828_v59 = vld [vmem:[#allocation5 + $0x10] ss:$8 sps:$4 sm:$0xff]  }
 0x189   :  { %v372_v55 = vpop.permute.xlu1 %371  ;;  %v819_v58 = vpack.c.bf16 %v438_v30, %v360_v44  ;;  %v214_v37 = vpop.permute.xlu0 %213  ;;  %v1821_v30 = vld [vmem:[#allocation5 + $0x44] ss:$8 sps:$4 sm:$0xff]   ;;  %v1822_v44 = vld [vmem:[#allocation5 + $0x30] ss:$8 sps:$4 sm:$0xff]  }
 0x18a   :  { %v379_v4 = vsel %vm377_vm5, %v372_v55, %v374_v48  ;;  %v380_v42 = vsel %vm377_vm5, %v370_v14, %v372_v55  ;;  %v176_v14 = vrot.slane %v2396_v22, %v1981_v6  ;;  %v225_v39 = vsel %vm221_vm7, %v2401_v26, %v214_v37  ;;  %v1807_v26 = vld [vmem:[#allocation5 + $0x80] ss:$8 sps:$4 sm:$0xff]  }
 0x18b   :  { %v436_v53 = vmul.f32 %v414_v63, %v380_v42  ;;  %v437_v52 = vmul.f32 %v418_v11, %v379_v4  ;;  %988 = vmatprep.subr.bf16.mxu1 %v819_v58  ;;  %v279_v1 = vmul.f32 %v254_v24, %v225_v39  ;;  %v1827_v63 = vld [vmem:[#allocation5 + $0x24] ss:$8 sps:$4 sm:$0xff]   ;;  %v1825_v11 = vld [vmem:[#allocation5 + $0x20] ss:$8 sps:$4 sm:$0xff]   ;;  %v1834_v4 = vld [vmem:[#allocation5 + $0xf0] ss:$8 sps:$4 sm:$0xff]  }
 0x18c   :  { %v1831_v55 = vld [vmem:[#allocation5 + $0x180] ss:$8 sps:$4 sm:$0xff]  }
 0x18d   :  { %v818_v43 = vpack.c.bf16 %v437_v52, %v359_v41  ;;  %v135_v9 = vpop.permute.xlu1 %134  ;;  %v817_v57 = vpack.c.bf16 %v436_v53, %v358_v16  ;;  %v218_v51 = vpop.permute.xlu0 %217  ;;  %v1832_v58 = vld [vmem:[#allocation5 + $0x100] ss:$8 sps:$4 sm:$0xff]   ;;  %v1837_v41 = vld [vmem:[#allocation5 + $0x150] ss:$8 sps:$4 sm:$0xff]  }
 0x18e   :  { %v222_v28 = vsel %vm221_vm7, %v218_v51, %v2414_v27  ;;  %v148_v27 = vsel %vm144_vm6, %v2391_v0, %v135_v9  ;;  %v147_v22 = vsel %vm144_vm6, %v135_v9, %v137_v23  ;;  %v1835_v42 = vld [vmem:[#allocation5 + $0x160] ss:$8 sps:$4 sm:$0xff]   ;;  %v1838_v53 = vld [vmem:[#allocation5 + $0xd0] ss:$8 sps:$4 sm:$0xff]  }
 0x18f   :  { %947 = vmatprep.subr.bf16.mxu0 %v817_v57  ;;  %989 = vmatpush1.bf16.msra.mxu1 %v818_v43  ;;  %v282_v62 = vmul.f32 %v266_v15, %v222_v28  ;;  %v201_v0 = vmul.f32 %v176_v14, %v148_v27  ;;  %v202_v6 = vmul.f32 %v180_v54, %v147_v22  ;;  %v1836_v16 = vld [vmem:[#allocation5 + $0xe0] ss:$8 sps:$4 sm:$0xff]   ;;  %v1841_v9 = vld [vmem:[#allocation5 + $0x130] ss:$8 sps:$4 sm:$0xff]  }
 0x190   :  { %948 = vmatpush1.bf16.msra.mxu0 %v816_v49  ;;  %v1812_v49 = vld [vmem:[#allocation5 + $0x74] ss:$8 sps:$4 sm:$0xff]   ;;  %v1839_v52 = vld [vmem:[#allocation5 + $0x140] ss:$8 sps:$4 sm:$0xff]   ;;  %v1842_v57 = vld [vmem:[#allocation5 + $0xb0] ss:$8 sps:$4 sm:$0xff]  }
 0x191   :  { %v139_v40 = vpop.permute.xlu1 %138  ;;  %v808_v5 = vpack.c.bf16 %v279_v1, %v201_v0  ;;  %v1840_v43 = vld [vmem:[#allocation5 + $0xc0] ss:$8 sps:$4 sm:$0xff]  }
 0x192   :  { %v145_v3 = vsel %vm144_vm6, %v139_v40, %v2439_v35  ;;  %v146_v35 = vsel %vm144_vm6, %v137_v23, %v139_v40  ;;  %v1813_v23 = vld [vmem:[#allocation5 + $0x60] ss:$8 sps:$4 sm:$0xff]  }
 0x193   :  { %v204_v46 = vmul.f32 %v188_v32, %v145_v3  ;;  %v203_v36 = vmul.f32 %v184_v45, %v146_v35 }
 0x195   :  { %v216_v21 = vpop.permute.xlu1 %215  ;;  %v811_v31 = vpack.c.bf16 %v282_v62, %v204_v46 }
 0x196   :  { %v223_v48 = vsel %vm221_vm7, %v216_v21, %v218_v51  ;;  %v224_v38 = vsel %vm221_vm7, %v214_v37, %v216_v21  ;;  %v1833_v37 = vld [vmem:[#allocation5 + $0x170] ss:$8 sps:$4 sm:$0xff]  }
 0x197   :  { %v280_v47 = vmul.f32 %v258_v33, %v224_v38  ;;  %v281_v29 = vmul.f32 %v262_v2, %v223_v48  ;;  %990 = vmatprep.subr.bf16.mxu1 %v811_v31 }
 0x199   :  { %v810_v20 = vpack.c.bf16 %v281_v29, %v203_v36  ;;  %v809_v19 = vpack.c.bf16 %v280_v47, %v202_v6 }
 0x19b   :  { %949 = vmatprep.subr.bf16.mxu0 %v809_v19  ;;  %991 = vmatpush1.bf16.msra.mxu1 %v810_v20  ;;  %v2627_v14 = vpop.permute.xlu0 %1026 }
 0x19c   :  { %950 = vmatpush1.bf16.msra.mxu0 %v808_v5  ;;  %1712 = vmatprep.subr.bf16.mxu1 %v1831_v55 }
 0x19d   :  { %1232 = vmatprep.subr.bf16.mxu0 %v1809_v50 }
 0x19e   :  { %1663 = vmatmul.mubr.msk.bf16.vlgmr.msra.gmra.mxu1 %vm849_vm8, %v2455_v56 }
 0x19f   :  { %1662 = vmatmul.mubr.msk.bf16.vlgmr.msra.gmra.mxu0 %vm849_vm8, %v2455_v56  ;;  %v1819_v56 = vld [vmem:[#allocation5 + $0x40] ss:$8 sps:$4 sm:$0xff]   ;;  %1713 = vmatpush3.bf16.msra.mxu1 %v1832_v58 }
 0x1a0   :  { %1264 = vmatprep.mubr.bf16.mxu0 %v2714_v34  ;;  %1233 = vmatpush1.bf16.msra.mxu0 %v1807_v26  ;;  %v1824_v34 = vld [vmem:[#allocation5 + $0x34] ss:$8 sps:$4 sm:$0xff]  }
 0x1a1   :  { %1234 = vmatprep.subr.bf16.mxu0 %v1812_v49  ;;  %1714 = vmatprep.subr.bf16.mxu1 %v1833_v37 }
 0x1a2   :  { %v2624_v51 = vpop.permute.xlu1 %846 }
 0x1a3   :  { %1715 = vmatpush3.bf16.msra.mxu1 %v1834_v4 }
 0x1a4   :  { %1235 = vmatpush1.bf16.msra.mxu0 %v1810_v61  ;;  %1716 = vmatprep.subr.bf16.mxu1 %v1835_v42 }
 0x1a5   :  { %1236 = vmatprep.subr.bf16.mxu0 %v1815_v7 }
 0x1a7   :  { %1717 = vmatpush3.bf16.msra.mxu1 %v1836_v16 }
 0x1a8   :  { %1237 = vmatpush1.bf16.msra.mxu0 %v1813_v23  ;;  %1718 = vmatprep.subr.bf16.mxu1 %v1837_v41 }
 0x1a9   :  { %1238 = vmatprep.subr.bf16.mxu0 %v1818_v17  ;;  %v2636_v17 = vpop.permute.xlu1 %1087 }
 0x1ab   :  { %1719 = vmatpush3.bf16.msra.mxu1 %v1838_v53 }
 0x1ac   :  { %1239 = vmatpush1.bf16.msra.mxu0 %v1816_v12  ;;  %1720 = vmatprep.subr.bf16.mxu1 %v1839_v52 }
 0x1ad   :  { %1240 = vmatprep.subr.bf16.mxu0 %v1821_v30 }
 0x1af   :  { %1721 = vmatpush3.bf16.msra.mxu1 %v1840_v43 }
 0x1b0   :  { %1241 = vmatpush1.bf16.msra.mxu0 %v1819_v56  ;;  %1722 = vmatprep.subr.bf16.mxu1 %v1841_v9 }
 0x1b1   :  { %1242 = vmatprep.subr.bf16.mxu0 %v1824_v34 }
 0x1b3   :  { %1723 = vmatpush3.bf16.msra.mxu1 %v1842_v57 }
 0x1b4   :  { %1243 = vmatpush1.bf16.msra.mxu0 %v1822_v44 }
 0x1b5   :  { %1244 = vmatprep.subr.bf16.mxu0 %v1827_v63 }
 0x1b8   :  { %1245 = vmatpush1.bf16.msra.mxu0 %v1825_v11 }
 0x1b9   :  { %1246 = vmatprep.subr.bf16.mxu0 %v1830_v60 }
 0x1bc   :  { %1247 = vmatpush1.bf16.msra.mxu0 %v1828_v59 }
 0x1bd   :  { %1748 = vmatprep.subr.bf16.mxu0 %v2715_v8 }
 0x22b   :  { %v928_v15 = vpop.f32.mrf.mxu1 }
 0x22c   :  { %v929_v32 = vadd.f32 %v928_v15, %v2624_v51 }
 0x22d   :  { %v930_v28 = vpop.f32.mrf.mxu1 }
 0x22e   :  { %v887_v40 = vpop.f32.mrf.mxu0  ;;  %v931_v54 = vadd.f32 %v930_v28, %v2624_v51  ;;  %v1019_v45 = vmax.f32 %v929_v32, 0.0 }
 0x22f   :  { %v888_v3 = vadd.f32 %v887_v40, %v2624_v51  ;;  %v932_v33 = vpop.f32.mrf.mxu1 }
 0x230   :  { %v1020_v62 = vmax.f32 %v931_v54, 0.0  ;;  %v889_v27 = vpop.f32.mrf.mxu0  ;;  %v1031_v46 = vmul.f32 %v2627_v14, %v1019_v45 }
 0x231   :  { %v1017_v2 = vmax.f32 %v888_v3, 0.0  ;;  %v890_v24 = vadd.f32 %v889_v27, %v2624_v51  ;;  %v933_v22 = vpop.f32.mrf.mxu1 }
 0x232   :  { %v1032_v35 = vmul.f32 %v2627_v14, %v1020_v62  ;;  %v1049_v39 = vrot.slane %v1031_v46, 4  ;;  %v891_v21 = vpop.f32.mrf.mxu0 }
 0x233   :  { %v1018_v31 = vmax.f32 %v890_v24, 0.0  ;;  %v1029_v0 = vmul.f32 %v2627_v14, %v1017_v2 }
 0x234   :  { %v1050_v48 = vadd.f32 %v1049_v39, %v1031_v46  ;;  %v1055_v38 = vrot.slane %v1032_v35, 4  ;;  %v892_v6 = vpop.f32.mrf.mxu0 }
 0x235   :  { %v1030_v36 = vmul.f32 %v2627_v14, %v1018_v31  ;;  %v1037_v47 = vrot.slane %v1029_v0, 4 }
 0x236   :  { %v1051_v29 = vrot.slane %v1050_v48, 2  ;;  %v1056_v1 = vadd.f32 %v1055_v38, %v1032_v35 }
 0x237   :  { %v1038_v20 = vadd.f32 %v1037_v47, %v1029_v0  ;;  %v1043_v19 = vrot.slane %v1030_v36, 4 }
 0x238   :  { %v1057_v5 = vrot.slane %v1056_v1, 2  ;;  %v1052_v50 = vadd.f32 %v1051_v29, %v1050_v48 }
 0x239   :  { %v1039_v26 = vrot.slane %v1038_v20, 2  ;;  %v1044_v49 = vadd.f32 %v1043_v19, %v1030_v36 }
 0x23a   :  { %v1053_v61 = vrot.slane %v1052_v50, 1  ;;  %v1058_v7 = vadd.f32 %v1057_v5, %v1056_v1 }
 0x23b   :  { %v1045_v23 = vrot.slane %v1044_v49, 2  ;;  %v1040_v12 = vadd.f32 %v1039_v26, %v1038_v20 }
 0x23c   :  { %v1054_v30 = vadd.f32 %v1053_v61, %v1052_v50  ;;  %v1059_v56 = vrot.slane %v1058_v7, 1 }
 0x23d   :  { %v1041_v34 = vrot.slane %v1040_v12, 1  ;;  %v1046_v44 = vadd.f32 %v1045_v23, %v1044_v49 }
 0x23e   :  { %v1060_v63 = vadd.f32 %v1059_v56, %v1058_v7  ;;  %v1092_v11 = vadd.f32 %v2636_v17, %v1054_v30 }
 0x23f   :  { %v1042_v60 = vadd.f32 %v1041_v34, %v1040_v12  ;;  %v1047_v59 = vrot.slane %v1046_v44, 1 }
 0x240   :  { %v1093_v55 = vadd.f32 %v2636_v17, %v1060_v63  ;;  %v1100_v58 = vadd.f32 %v1092_v11, %v2006_v13  ;;  %v2716_v63 = vld [vmem:[#allocation13_spill] sm:$0xff] }
 0x241   :  { %v1048_v37 = vadd.f32 %v1047_v59, %v1046_v44  ;;  %v1090_v4 = vadd.f32 %v2636_v17, %v1042_v60  ;;  %v2717_v59 = vld [vmem:[#allocation10_spill] sm:$0xff] }
 0x242   :  { %v1101_v42 = vadd.f32 %v1093_v55, %v2019_v18  ;;  %v1108_v16 = vmax.f32 %v1100_v58, 0.0 }
 0x243   :  { %v1091_v41 = vadd.f32 %v2636_v17, %v1048_v37  ;;  %v1098_v53 = vadd.f32 %v1090_v4, %v2032_v25  ;;  %v2718_v4 = vld [vmem:[#allocation12_spill] sm:$0xff] }
 0x244   :  { %v1109_v52 = vmax.f32 %v1101_v42, 0.0  ;;  %1116 = vst [vmem:[#allocation2 + $0x2] sm:$0x1] %v1108_v16 }
 0x245   :  { %v1099_v43 = vadd.f32 %v1091_v41, %v1995_v10  ;;  %v1106_v9 = vmax.f32 %v1098_v53, 0.0  ;;  %v2719_v41 = vld [vmem:[#allocation14_spill] sm:$0xff] }
 0x246   :  { %1117 = vst [vmem:[#allocation2 + $0x3] sm:$0x1] %v1109_v52 }
 0x247   :  { %v1107_v57 = vmax.f32 %v1099_v43, 0.0  ;;  %1114 = vst [vmem:[#allocation2] sm:$0x1] %v1106_v9 }
 0x249   :  { %1115 = vst [vmem:[#allocation2 + $0x1] sm:$0x1] %v1107_v57 }
 0x25e   :  { %v1010_v13 = vpop.f32.mrf.mxu1 }
 0x25f   :  { %v1011_v15 = vadd.f32 %v1010_v13, %v2624_v51  ;;  %v969_v32 = vpop.f32.mrf.mxu0  ;;  %v1843_v13 = vld [vmem:[#allocation5 + $0x120] ss:$8 sps:$4 sm:$0xff]  }
 0x260   :  { %v970_v18 = vadd.f32 %v969_v32, %v2624_v51  ;;  %v1012_v28 = vpop.f32.mrf.mxu1  ;;  %1724 = vmatprep.subr.bf16.mxu1 %v1843_v13  ;;  %v1846_v32 = vld [vmem:[#allocation5 + $0x90] ss:$8 sps:$4 sm:$0xff]  }
 0x261   :  { %v1023_v40 = vmax.f32 %v1011_v15, 0.0  ;;  %v1013_v54 = vadd.f32 %v1012_v28, %v2624_v51  ;;  %v971_v25 = vpop.f32.mrf.mxu0  ;;  %v1844_v15 = vld [vmem:[#allocation5 + $0xa0] ss:$8 sps:$4 sm:$0xff]   ;;  %v1848_v28 = vld [vmem:[#allocation5 + $0x1f0] ss:$8 sps:$4 sm:$0xff]  }
 0x262   :  { %v1021_v45 = vmax.f32 %v970_v18, 0.0  ;;  %v972_v3 = vadd.f32 %v971_v25, %v2624_v51  ;;  %v1014_v10 = vpop.f32.mrf.mxu1  ;;  %1725 = vmatpush3.bf16.msra.mxu1 %v1844_v15  ;;  %v1847_v18 = vld [vmem:[#allocation5 + $0x200] ss:$8 sps:$4 sm:$0xff]  }
 0x263   :  { %v1035_v33 = vmul.f32 %v2627_v14, %v1023_v40  ;;  %v1024_v62 = vmax.f32 %v1013_v54, 0.0  ;;  %v973_v27 = vpop.f32.mrf.mxu0  ;;  %v1849_v40 = vld [vmem:[#allocation5 + $0x1e0] ss:$8 sps:$4 sm:$0xff]   ;;  %v1850_v54 = vld [vmem:[#allocation5 + $0x1d0] ss:$8 sps:$4 sm:$0xff]  }
 0x264   :  { %v1033_v46 = vmul.f32 %v2627_v14, %v1021_v45  ;;  %v1022_v2 = vmax.f32 %v972_v3, 0.0  ;;  %v1015_v24 = vpop.f32.mrf.mxu1  ;;  %v1851_v25 = vld [vmem:[#allocation5 + $0x1c0] ss:$8 sps:$4 sm:$0xff]   ;;  %v1140_v45 = vld [vmem:[%s2695_s3] ss:$4 sm:$0x3] }
 0x265   :  { %v1073_v22 = vrot.slane %v1035_v33, 4  ;;  %v1036_v35 = vmul.f32 %v2627_v14, %v1024_v62  ;;  %v974_v39 = vpop.f32.mrf.mxu0  ;;  %v2720_v3 = vld [vmem:[#allocation11_spill] sm:$0xff] }
 0x266   :  { %v1061_v21 = vrot.slane %v1033_v46, 4  ;;  %v1034_v31 = vmul.f32 %v2627_v14, %v1022_v2  ;;  %v1145_v10 = vrot.slane %v1140_v45, %v2720_v3 }
 0x267   :  { %v1074_v0 = vadd.f32 %v1073_v22, %v1035_v33  ;;  %v1079_v48 = vrot.slane %v1036_v35, 4  ;;  %v2721_v33 = vld [vmem:[#allocation9_spill] sm:$0xff] }
 0x268   :  { %v1062_v38 = vadd.f32 %v1061_v21, %v1033_v46  ;;  %v1067_v51 = vrot.slane %v1034_v31, 4  ;;  %v1149_v62 = vrot.slane %v1140_v45, %v2721_v33 }
 0x269   :  { %v1075_v6 = vrot.slane %v1074_v0, 2  ;;  %v1080_v36 = vadd.f32 %v1079_v48, %v1036_v35  ;;  %v1852_v48 = vld [vmem:[#allocation5 + $0x1b0] ss:$8 sps:$4 sm:$0xff]  }
 0x26a   :  { %v1063_v47 = vrot.slane %v1062_v38, 2  ;;  %v1068_v29 = vadd.f32 %v1067_v51, %v1034_v31  ;;  %v1854_v51 = vld [vmem:[#allocation5 + $0x190] ss:$8 sps:$4 sm:$0xff]  }
 0x26b   :  { %v1076_v1 = vadd.f32 %v1075_v6, %v1074_v0  ;;  %v1081_v20 = vrot.slane %v1080_v36, 2  ;;  %v1855_v6 = vld [vmem:[#allocation5 + $0x240] ss:$8 sps:$4 sm:$0xff]  }
 0x26c   :  { %v1064_v19 = vadd.f32 %v1063_v47, %v1062_v38  ;;  %v1069_v5 = vrot.slane %v1068_v29, 2  ;;  %v1853_v38 = vld [vmem:[#allocation5 + $0x1a0] ss:$8 sps:$4 sm:$0xff]  }
 0x26d   :  { %v1077_v50 = vrot.slane %v1076_v1, 1  ;;  %v1082_v26 = vadd.f32 %v1081_v20, %v1080_v36  ;;  %v1856_v36 = vld [vmem:[#allocation5 + $0x230] ss:$8 sps:$4 sm:$0xff]  }
 0x26e   :  { %v1065_v49 = vrot.slane %v1064_v19, 1  ;;  %v1070_v61 = vadd.f32 %v1069_v5, %v1068_v29  ;;  %v1680_v29 = vld [vmem:[%s2695_s3 + $0x1] ss:$0 sm:$0xff] }
 0x26f   :  { %v1078_v7 = vadd.f32 %v1077_v50, %v1076_v1  ;;  %v1083_v23 = vrot.slane %v1082_v26, 1 }
 0x270   :  { %v1066_v12 = vadd.f32 %v1065_v49, %v1064_v19  ;;  %v1071_v14 = vrot.slane %v1070_v61, 1 }
 0x271   :  { %v1096_v30 = vadd.f32 %v2636_v17, %v1078_v7  ;;  %v1084_v56 = vadd.f32 %v1083_v23, %v1082_v26  ;;  %v1858_v7 = vld [vmem:[#allocation5 + $0x210] ss:$8 sps:$4 sm:$0xff]  }
 0x272   :  { %v1094_v34 = vadd.f32 %v2636_v17, %v1066_v12  ;;  %v1072_v44 = vadd.f32 %v1071_v14, %v1070_v61  ;;  %v1857_v61 = vld [vmem:[#allocation5 + $0x220] ss:$8 sps:$4 sm:$0xff]   ;;  %v1697_v23 = vld [vmem:[%s2695_s3 + $0x2] ss:$0 sm:$0xff] }
 0x273   :  { %v1104_v11 = vadd.f32 %v1096_v30, %v2716_v63  ;;  %v1097_v60 = vadd.f32 %v2636_v17, %v1084_v56 }
 0x274   :  { %v1102_v55 = vadd.f32 %v1094_v34, %v2717_v59  ;;  %v1095_v58 = vadd.f32 %v2636_v17, %v1072_v44  ;;  %v1845_v17 = vld [vmem:[#allocation5 + $0x110] ss:$8 sps:$4 sm:$0xff]  }
 0x275   :  { %v1112_v37 = vmax.f32 %v1104_v11, 0.0  ;;  %v1105_v42 = vadd.f32 %v1097_v60, %v2718_v4  ;;  %1726 = vmatprep.subr.bf16.mxu1 %v1845_v17  ;;  %v1706_v11 = vld [vmem:[%s2695_s3 + $0x3] ss:$0 sm:$0xff] }
 0x276   :  { %v1110_v16 = vmax.f32 %v1102_v55, 0.0  ;;  %v1103_v53 = vadd.f32 %v1095_v58, %v2719_v41  ;;  %1727 = vmatpush3.bf16.msra.mxu1 %v1846_v32 }
 0x277   :  { %1120 = vst [vmem:[#allocation2 + $0x6] sm:$0x1] %v1112_v37  ;;  %v1113_v52 = vmax.f32 %v1105_v42, 0.0  ;;  %1768 = vmatprep.subr.bf16.mxu1 %v2715_v8 }
 0x278   :  { %1118 = vst [vmem:[#allocation2 + $0x4] sm:$0x1] %v1110_v16  ;;  %v1111_v43 = vmax.f32 %v1103_v53, 0.0 }
 0x279   :  { %1121 = vst [vmem:[#allocation2 + $0x7] sm:$0x1] %v1113_v52 }
 0x27a   :  { %1119 = vst [vmem:[#allocation2 + $0x5] sm:$0x1] %v1111_v43 }
 0x281   :  { %v1122_v9 = vld [vmem:[#allocation2] sm:$0xff] }
 0x282   :  { %v1139_v57 = vpack.c.bf16 %v1122_v9, %v1122_v9 }
 0x284   :  { %1265 = vmatmul.mubr.bf16.vlgmr.msra.gmra.mxu0 %v1139_v57 }
 0x285   :  { %1749 = vmatpush3.bf16.msra.mxu0 %v1847_v18  ;;  %1764 = vmatprep.mubr.msk.bf16.mxu0 %vm1927_vm9, %v2715_v8 }
 0x286   :  { %1750 = vmatprep.subr.bf16.mxu0 %v2715_v8 }
 0x289   :  { %1751 = vmatpush3.bf16.msra.mxu0 %v1848_v28 }
 0x28a   :  { %1752 = vmatprep.subr.bf16.mxu0 %v2715_v8 }
 0x28d   :  { %1753 = vmatpush3.bf16.msra.mxu0 %v1849_v40 }
 0x28e   :  { %1754 = vmatprep.subr.bf16.mxu0 %v2715_v8 }
 0x291   :  { %1755 = vmatpush3.bf16.msra.mxu0 %v1850_v54 }
 0x292   :  { %1756 = vmatprep.subr.bf16.mxu0 %v2715_v8 }
 0x295   :  { %1757 = vmatpush3.bf16.msra.mxu0 %v1851_v25 }
 0x296   :  { %1758 = vmatprep.subr.bf16.mxu0 %v2715_v8 }
 0x299   :  { %1759 = vmatpush3.bf16.msra.mxu0 %v1852_v48 }
 0x29a   :  { %1760 = vmatprep.subr.bf16.mxu0 %v2715_v8 }
 0x29d   :  { %1761 = vmatpush3.bf16.msra.mxu0 %v1853_v38 }
 0x29e   :  { %1762 = vmatprep.subr.bf16.mxu0 %v2715_v8 }
 0x2a1   :  { %1763 = vmatpush3.bf16.msra.mxu0 %v1854_v51 }
 0x344   :  { %v1266_v27 = vpop.f32.mrf.mxu0 }
 0x345   :  { %v1267_v46 = vadd.f32 %v1266_v27, %v1145_v10 }
 0x346   :  { %v1268_v2 = vpop.f32.mrf.mxu0 }
 0x347   :  { %v1269_v24 = vadd.f32 %v1268_v2, %v1149_v62  ;;  %v1273_v22 = vmax.f32 %v1267_v46, 0.0 }
 0x348   :  { %v1270_v35 = vpop.f32.mrf.mxu0 }
 0x349   :  { %v1274_v39 = vmax.f32 %v1269_v24, 0.0  ;;  %v1307_v0 = vpack.c.bf16 %v1273_v22, %v1273_v22 }
 0x34a   :  { %v1271_v21 = vpop.f32.mrf.mxu0 }
 0x34b   :  { %v1308_v31 = vpack.c.bf16 %v1274_v39, %v1274_v39 }
 0x34d   :  { %1442 = vmatprep.mubr.bf16.mxu1 %v1308_v31 }
 0x34e   :  { %1443 = vmatmul.mubr.bf16.vlgmr.msra.gmra.mxu1 %v1307_v0 }
 0x34f   :  { %1776 = vmatprep.mubr.msk.bf16.mxu1 %vm1927_vm9, %v2715_v8  ;;  %1769 = vmatpush3.bf16.msra.mxu1 %v1855_v6 }
 0x350   :  { %1770 = vmatprep.subr.bf16.mxu1 %v2715_v8 }
 0x353   :  { %1771 = vmatpush3.bf16.msra.mxu1 %v1856_v36 }
 0x354   :  { %1772 = vmatprep.subr.bf16.mxu1 %v2715_v8 }
 0x357   :  { %1773 = vmatpush3.bf16.msra.mxu1 %v1857_v61 }
 0x358   :  { %1774 = vmatprep.subr.bf16.mxu1 %v2715_v8 }
 0x35b   :  { %1775 = vmatpush3.bf16.msra.mxu1 %v1858_v7 }
 0x40e   :  { %v1728_v47 = vpop.f32.mrf.mxu1 }
 0x410   :  { %v1729_v1 = vpop.f32.mrf.mxu1 }
 0x411   :  { %v1730_v20 = vadd.f32 %v1729_v1, %v1728_v47 }
 0x412   :  { %v1731_v19 = vpop.f32.mrf.mxu1 }
 0x413   :  { %v1445_v5 = vadd.f32 %v1730_v20, %v1680_v29 }
 0x414   :  { %v1732_v50 = vpop.f32.mrf.mxu1 }
 0x415   :  { %v1450_v26 = vmax.f32 %v1445_v5, 0.0 }
 0x417   :  { %v1467_v49 = vpack.c.bf16 %v1450_v26, %v1450_v26 }
 0x419   :  { %1765 = vmatmul.mubr.bf16.vlgmr.msra.gmra.mxu0 %v1467_v49 }
 0x4d9   :  { %v1555_v12 = vpop.f32.mrf.mxu0 }
 0x4da   :  { %v1556_v14 = vadd.f32 %v1697_v23, %v1555_v12 }
 0x4db   :  { %v1766_v30 = vpop.f32.mrf.mxu0 }
 0x4dc   :  { %v1561_v56 = vmax.f32 %v1556_v14, 0.0 }
 0x4dd   :  { %v1558_v34 = vpop.f32.mrf.mxu0 }
 0x4de   :  { %v1570_v44 = vpack.c.bf16 %v1561_v56, %v1561_v56 }
 0x4df   :  { %v1767_v63 = vpop.f32.mrf.mxu0 }
 0x4e0   :  { %1777 = vmatmul.mubr.msk.bf16.vlgmr.msra.gmra.mxu1 %vm1600_vm10, %v1570_v44 }
 0x5a0   :  { %v1638_v8 = vpop.f32.mrf.mxu1 }
 0x5a1   :  { %v1639_v60 = vadd.f32 %v1706_v11, %v1638_v8 }
 0x5a2   :  { %v1778_v59 = vpop.f32.mrf.mxu1 }
 0x5a3   :  { %1644 = vmax.xlane.f32.xlu1 %v1639_v60 }
 0x5a4   :  { %v1641_v55 = vpop.f32.mrf.mxu1 }
 0x5a6   :  { %v1779_v58 = vpop.f32.mrf.mxu1 }
 0x62c   :  { %v1645_v37 = vpop.xlane.xlu1 %1644 }
 0x62d   :  { %v1646_v4 = vsub.f32 %v1639_v60, %v1645_v37 }
 0x62f   :  { %v1647_v42 = vmul.f32 1.442695, %v1646_v4 }
 0x631   :  { %1859 = vpow2.f32 %v1647_v42 }
 0x63e   :  { %v1860_v16 = vpop.eup %1859 }
 0x63f   :  { %1649 = vadd.xlane.f32.xlu0 %v1860_v16 }
 0x6c8   :  { %v1650_v41 = vpop.xlane.xlu0 %1649 }
 0x6c9   :  { %1861 = vrcp.f32 %v1650_v41 }
 0x6d6   :  { %v1862_v53 = vpop.eup %1861 }
 0x6d7   :  { %v1652_v52 = vmul.f32 %v1862_v53, %v1860_v16 }
 0x6d9   :  { %1653 = vst [vmem:[%s2697_s5] sm:$0xff] %v1652_v52 }
 0x6da   :  { %1658 = vsyncpa [#allocation4], 1 }
 0x6db   :  { %1659 = vsyncpa [#allocation6], 1 }

</bundles_post_ra>
